<compile_context>
chip_gen: v6e
topology: v6e:2x2x1
jax: 0.10.0
libtpu: 0.0.40
codegen_flags: <defaults>
</compile_context>

<pallas_src>
import math
import functools

import jax
import jax.numpy as jnp
from jax import lax
from jax.experimental import pallas as pl
from jax.experimental.pallas import tpu as pltpu

# ----------------------------- small config ---------------------------------
B = 2              # batch
T = 8              # decoder sequence length
S = 8              # encoder sequence length
C = 32             # n_embd
N_HEAD = 2
HEAD_DIM = C // N_HEAD
MLP_H = 4 * C
ADAPT_H = 128      # adapter hidden size (hard-coded 128 in the PyTorch module)

MXU_DTYPE = jnp.bfloat16   # MXU operand dtype; accumulation stays f32
NEG_INF = -1e30
LN_EPS = 1e-5


# --------------------------- in-kernel helpers -------------------------------
def _layernorm_f32(x, g, b):
    mu = jnp.mean(x, axis=-1, keepdims=True)
    var = jnp.mean(jnp.square(x - mu), axis=-1, keepdims=True)
    return (x - mu) * lax.rsqrt(var + LN_EPS) * g + b


def _gelu_tanh(x):
    c = math.sqrt(2.0 / math.pi)
    return 0.5 * x * (1.0 + jnp.tanh(c * (x + 0.044715 * x * x * x)))


def _linear(x_f32, w_bf16, b_f32):
    """x @ W + b with bf16 MXU operands and f32 accumulation."""
    y = jnp.dot(x_f32.astype(MXU_DTYPE), w_bf16,
                preferred_element_type=jnp.float32)
    return y + b_f32


def _mha(q, k, v, n_head, causal):
    """Multi-head attention on VMEM-resident [T, C] / [S, C] values.

    Head split (lane slices) and merge (lane concat) happen on values; the
    merged [T, C] result never round-trips through HBM.  Scores/softmax in f32.
    """
    t, c = q.shape
    s = k.shape[0]
    hd = c // n_head
    scale = 1.0 / math.sqrt(hd)
    if causal:
        row = lax.broadcasted_iota(jnp.int32, (t, s), 0)
        col = lax.broadcasted_iota(jnp.int32, (t, s), 1)
        keep = col <= row
    heads = []
    for h in range(n_head):          # tiny static loop (n_head=2)
        sl = slice(h * hd, (h + 1) * hd)
        qh = q[:, sl].astype(MXU_DTYPE)
        kh = k[:, sl].astype(MXU_DTYPE)
        vh = v[:, sl].astype(MXU_DTYPE)
        att = jnp.einsum('td,sd->ts', qh, kh,
                         preferred_element_type=jnp.float32) * scale
        if causal:
            att = jnp.where(keep, att, NEG_INF)
        att = att - jnp.max(att, axis=-1, keepdims=True)
        p = jnp.exp(att)
        p = p * pl.reciprocal(jnp.sum(p, axis=-1, keepdims=True), approx=True)
        heads.append(jnp.dot(p.astype(MXU_DTYPE), vh,
                             preferred_element_type=jnp.float32))
    return jnp.concatenate(heads, axis=-1)        # [T, C], lane-dense


# ------------------------------- fused kernel --------------------------------
def _block_kernel(x_ref, enc_ref,
                  ln1_g, ln1_b, wqkv, bqkv, wproj, bproj,
                  a1w1, a1b1, a1w2, a1b2,
                  wq, bq, wk, bk, wv, bv, wcp, bcp,
                  ln2_g, ln2_b, wfc, bfc, wmp, bmp,
                  a2w1, a2b1, a2w2, a2b2,
                  o_ref, *, n_head):
    x = x_ref[0]                # [T, C] f32 — this grid step's batch element
    enc = enc_ref[0]            # [S, C] f32
    c = x.shape[-1]

    # ---- x = x + attn(ln_1(x))  (causal self-attention) ---------------------
    h = _layernorm_f32(x, ln1_g[...], ln1_b[...])
    qkv = _linear(h, wqkv[...], bqkv[...])                 # [T, 3C] in VMEM
    q, k, v = qkv[:, :c], qkv[:, c:2 * c], qkv[:, 2 * c:]
    y = _mha(q, k, v, n_head, causal=True)
    x = x + _linear(y, wproj[...], bproj[...])             # fused residual add

    # ---- x = x + adapter_layer1(x) ------------------------------------------
    a = _gelu_tanh(_linear(x, a1w1[...], a1b1[...]))
    x = x + _linear(a, a1w2[...], a1b2[...])

    # ---- x = x + crossattn(x, encoder_output) -------------------------------
    q = _linear(x, wq[...], bq[...])
    k = _linear(enc, wk[...], bk[...])
    v = _linear(enc, wv[...], bv[...])
    y = _mha(q, k, v, n_head, causal=False)
    x = x + _linear(y, wcp[...], bcp[...])

    # ---- x = x + mlp(ln_2(x)) ------------------------------------------------
    h = _layernorm_f32(x, ln2_g[...], ln2_b[...])
    m = _gelu_tanh(_linear(h, wfc[...], bfc[...]))
    x = x + _linear(m, wmp[...], bmp[...])

    # ---- x = x + adapter_layer2(x) -------------------------------------------
    a = _gelu_tanh(_linear(x, a2w1[...], a2b1[...]))
    x = x + _linear(a, a2w2[...], a2b2[...])

    o_ref[0] = x                # single lane-dense [T, C] store


# ------------------------------ kernel wrapper --------------------------------
# (name, kind): 'm' -> bf16 matmul weight, 'v' -> f32 (1, N) row vector
_WEIGHT_ORDER = [
    ('ln1_g', 'v'), ('ln1_b', 'v'),
    ('attn_cattn_w', 'm'), ('attn_cattn_b', 'v'),
    ('attn_cproj_w', 'm'), ('attn_cproj_b', 'v'),
    ('ad1_w1', 'm'), ('ad1_b1', 'v'), ('ad1_w2', 'm'), ('ad1_b2', 'v'),
    ('ca_q_w', 'm'), ('ca_q_b', 'v'), ('ca_k_w', 'm'), ('ca_k_b', 'v'),
    ('ca_v_w', 'm'), ('ca_v_b', 'v'), ('ca_cproj_w', 'm'), ('ca_cproj_b', 'v'),
    ('ln2_g', 'v'), ('ln2_b', 'v'),
    ('mlp_fc_w', 'm'), ('mlp_fc_b', 'v'),
    ('mlp_proj_w', 'm'), ('mlp_proj_b', 'v'),
    ('ad2_w1', 'm'), ('ad2_b1', 'v'), ('ad2_w2', 'm'), ('ad2_b2', 'v'),
]


def block_forward(params, x, enc):
    b, t, c = x.shape
    s = enc.shape[1]

    operands = []
    for name, kind in _WEIGHT_ORDER:
        p = params[name]
        if kind == 'm':
            operands.append(p.astype(MXU_DTYPE))   # bf16 MXU weight (half DMA)
        else:
            operands.append(p.reshape(1, -1))       # f32 bias / LN row vector

    in_specs = [pl.BlockSpec((1, t, c), lambda i: (i, 0, 0)),
                pl.BlockSpec((1, s, c), lambda i: (i, 0, 0))]
    in_specs += [pl.BlockSpec(op.shape, lambda i: (0, 0)) for op in operands]
    out_spec = pl.BlockSpec((1, t, c), lambda i: (i, 0, 0))

    nbytes = lambda a: int(a.size) * a.dtype.itemsize
    bytes_accessed = (2 * nbytes(x) + nbytes(enc)
                      + sum(nbytes(op) for op in operands))
    flops_per_b = (
        2 * t * c * 3 * c + 4 * t * t * c + 2 * t * c * c                 # self-attn
        + 4 * t * c * ADAPT_H                                             # adapter 1
        + 2 * t * c * c + 4 * s * c * c + 4 * t * s * c + 2 * t * c * c   # cross-attn
        + 4 * t * c * MLP_H                                               # MLP
        + 4 * t * c * ADAPT_H                                             # adapter 2
    )
    transcendentals = b * (t * (MLP_H + 2 * ADAPT_H)      # GELU tanh
                           + N_HEAD * t * (t + s))        # softmax exp
    cost = pl.CostEstimate(flops=b * flops_per_b,
                           transcendentals=transcendentals,
                           bytes_accessed=bytes_accessed)

    return pl.pallas_call(
        functools.partial(_block_kernel, n_head=N_HEAD),
        out_shape=jax.ShapeDtypeStruct((b, t, c), jnp.float32),
        grid=(b,),
        in_specs=in_specs,
        out_specs=out_spec,
        compiler_params=pltpu.CompilerParams(
            dimension_semantics=("parallel",),        # v7x: shard batch on 2 TCs
            vmem_limit_bytes=32 * 1024 * 1024),
        cost_estimate=cost,
    )(x, enc, *operands)


# ---------------------- pure-JAX reference (torch semantics) ------------------
def block_reference(params, x, enc):
    p = params

    def ln(v, g, b):
        mu = v.mean(-1, keepdims=True)
        var = ((v - mu) ** 2).mean(-1, keepdims=True)
        return (v - mu) / jnp.sqrt(var + LN_EPS) * g + b

    def gelu(v):
        cst = math.sqrt(2.0 / math.pi)
        return 0.5 * v * (1.0 + jnp.tanh(cst * (v + 0.044715 * v ** 3)))

    def lin(v, w, bias):
        return v @ w + bias

    def mha(q, k, v, causal):
        b_, t_, c_ = q.shape
        s_ = k.shape[1]
        hd = c_ // N_HEAD
        qh = q.reshape(b_, t_, N_HEAD, hd).transpose(0, 2, 1, 3)
        kh = k.reshape(b_, s_, N_HEAD, hd).transpose(0, 2, 1, 3)
        vh = v.reshape(b_, s_, N_HEAD, hd).transpose(0, 2, 1, 3)
        att = jnp.einsum('bhtd,bhsd->bhts', qh, kh) / math.sqrt(hd)
        if causal:
            mask = jnp.tril(jnp.ones((t_, s_), bool))
            att = jnp.where(mask, att, -jnp.inf)
        prob = jax.nn.softmax(att, axis=-1)
        y = jnp.einsum('bhts,bhsd->bhtd', prob, vh)
        return y.transpose(0, 2, 1, 3).reshape(b_, t_, c_)

    h = ln(x, p['ln1_g'], p['ln1_b'])
    qkv = lin(h, p['attn_cattn_w'], p['attn_cattn_b'])
    q, k, v = jnp.split(qkv, 3, axis=-1)
    x = x + lin(mha(q, k, v, True), p['attn_cproj_w'], p['attn_cproj_b'])

    a = gelu(lin(x, p['ad1_w1'], p['ad1_b1']))
    x = x + lin(a, p['ad1_w2'], p['ad1_b2'])

    q = lin(x, p['ca_q_w'], p['ca_q_b'])
    k = lin(enc, p['ca_k_w'], p['ca_k_b'])
    v = lin(enc, p['ca_v_w'], p['ca_v_b'])
    x = x + lin(mha(q, k, v, False), p['ca_cproj_w'], p['ca_cproj_b'])

    h = ln(x, p['ln2_g'], p['ln2_b'])
    m = gelu(lin(h, p['mlp_fc_w'], p['mlp_fc_b']))
    x = x + lin(m, p['mlp_proj_w'], p['mlp_proj_b'])

    a = gelu(lin(x, p['ad2_w1'], p['ad2_b1']))
    x = x + lin(a, p['ad2_w2'], p['ad2_b2'])
    return x


# ------------------------------ parameter init --------------------------------
def init_params(key):
    keys = iter(jax.random.split(key, 64))

    def w(shape, scale=0.02):
        return jax.random.normal(next(keys), shape, jnp.float32) * scale

    def bvec(shape):     # small random bias so the add paths are exercised
        return jax.random.normal(next(keys), shape, jnp.float32) * 0.02

    def gvec(shape):     # LN gamma near 1
        return 1.0 + jax.random.normal(next(keys), shape, jnp.float32) * 0.02

    return dict(
        ln1_g=gvec((C,)), ln1_b=bvec((C,)),
        attn_cattn_w=w((C, 3 * C)), attn_cattn_b=bvec((3 * C,)),
        attn_cproj_w=w((C, C)), attn_cproj_b=bvec((C,)),
        ad1_w1=w((C, ADAPT_H)), ad1_b1=bvec((ADAPT_H,)),
        ad1_w2=w((ADAPT_H, C)), ad1_b2=bvec((C,)),
        ca_q_w=w((C, C)), ca_q_b=bvec((C,)),
        ca_k_w=w((C, C)), ca_k_b=bvec((C,)),
        ca_v_w=w((C, C)), ca_v_b=bvec((C,)),
        ca_cproj_w=w((C, C)), ca_cproj_b=bvec((C,)),
        ln2_g=gvec((C,)), ln2_b=bvec((C,)),
        mlp_fc_w=w((C, MLP_H)), mlp_fc_b=bvec((MLP_H,)),
        mlp_proj_w=w((MLP_H, C)), mlp_proj_b=bvec((C,)),
        ad2_w1=w((C, ADAPT_H)), ad2_b1=bvec((ADAPT_H,)),
        ad2_w2=w((ADAPT_H, C)), ad2_b2=bvec((C,)),
    )


# ---------------------------------- main --------------------------------------
if __name__ == "__main__":
    key = jax.random.PRNGKey(0)
    kp, kx, ke = jax.random.split(key, 3)
    params = init_params(kp)

    x = jax.random.normal(kx, (B, T, C), jnp.float32)          # decoder states
    enc = jax.random.normal(ke, (B, S, C), jnp.float32)        # encoder output

    out = jax.jit(block_forward)(params, x, enc)
    jax.block_until_ready(out)

    assert out.shape == (B, T, C)
    assert bool(jnp.all(jnp.isfinite(out)))

    # f32 reference of the exact torch forward; bf16 MXU operands keep us well
    # within a loose tolerance at these scales.
    ref = block_reference(params, x, enc)
    max_err = float(jnp.max(jnp.abs(out - ref)))
    assert max_err < 5e-2, f"kernel/reference mismatch: max abs err {max_err}"

    print("KERNEL_OK")
</pallas_src>

<mosaic_0001>
module attributes {stable_mosaic.version = 11 : i64} {
  func.func @_block_kernel(%arg0: i32, %arg1: memref<1x8x32xf32, #tpu.memory_space<vmem>>, %arg2: memref<1x8x32xf32, #tpu.memory_space<vmem>>, %arg3: memref<1x32xf32, #tpu.memory_space<vmem>>, %arg4: memref<1x32xf32, #tpu.memory_space<vmem>>, %arg5: memref<32x96xbf16, #tpu.memory_space<vmem>>, %arg6: memref<1x96xf32, #tpu.memory_space<vmem>>, %arg7: memref<32x32xbf16, #tpu.memory_space<vmem>>, %arg8: memref<1x32xf32, #tpu.memory_space<vmem>>, %arg9: memref<32x128xbf16, #tpu.memory_space<vmem>>, %arg10: memref<1x128xf32, #tpu.memory_space<vmem>>, %arg11: memref<128x32xbf16, #tpu.memory_space<vmem>>, %arg12: memref<1x32xf32, #tpu.memory_space<vmem>>, %arg13: memref<32x32xbf16, #tpu.memory_space<vmem>>, %arg14: memref<1x32xf32, #tpu.memory_space<vmem>>, %arg15: memref<32x32xbf16, #tpu.memory_space<vmem>>, %arg16: memref<1x32xf32, #tpu.memory_space<vmem>>, %arg17: memref<32x32xbf16, #tpu.memory_space<vmem>>, %arg18: memref<1x32xf32, #tpu.memory_space<vmem>>, %arg19: memref<32x32xbf16, #tpu.memory_space<vmem>>, %arg20: memref<1x32xf32, #tpu.memory_space<vmem>>, %arg21: memref<1x32xf32, #tpu.memory_space<vmem>>, %arg22: memref<1x32xf32, #tpu.memory_space<vmem>>, %arg23: memref<32x128xbf16, #tpu.memory_space<vmem>>, %arg24: memref<1x128xf32, #tpu.memory_space<vmem>>, %arg25: memref<128x32xbf16, #tpu.memory_space<vmem>>, %arg26: memref<1x32xf32, #tpu.memory_space<vmem>>, %arg27: memref<32x128xbf16, #tpu.memory_space<vmem>>, %arg28: memref<1x128xf32, #tpu.memory_space<vmem>>, %arg29: memref<128x32xbf16, #tpu.memory_space<vmem>>, %arg30: memref<1x32xf32, #tpu.memory_space<vmem>>, %arg31: memref<1x8x32xf32, #tpu.memory_space<vmem>>) attributes {dimension_semantics = [#tpu.dimension_semantics<parallel>], iteration_bounds = array<i64: 2>, scalar_prefetch = 0 : i64, scratch_operands = 0 : i64, tpu.core_type = #tpu.core_type<tc>, window_params = [{transform_indices = @transform_0, window_bounds = array<i64: 1, 8, 32>}, {transform_indices = @transform_1, window_bounds = array<i64: 1, 8, 32>}, {pipeline_mode = #tpu.pipeline_mode<synchronous>, transform_indices = @transform_2, window_bounds = array<i64: 1, 32>}, {pipeline_mode = #tpu.pipeline_mode<synchronous>, transform_indices = @transform_3, window_bounds = array<i64: 1, 32>}, {pipeline_mode = #tpu.pipeline_mode<synchronous>, transform_indices = @transform_4, window_bounds = array<i64: 32, 96>}, {pipeline_mode = #tpu.pipeline_mode<synchronous>, transform_indices = @transform_5, window_bounds = array<i64: 1, 96>}, {pipeline_mode = #tpu.pipeline_mode<synchronous>, transform_indices = @transform_6, window_bounds = array<i64: 32, 32>}, {pipeline_mode = #tpu.pipeline_mode<synchronous>, transform_indices = @transform_7, window_bounds = array<i64: 1, 32>}, {pipeline_mode = #tpu.pipeline_mode<synchronous>, transform_indices = @transform_8, window_bounds = array<i64: 32, 128>}, {pipeline_mode = #tpu.pipeline_mode<synchronous>, transform_indices = @transform_9, window_bounds = array<i64: 1, 128>}, {pipeline_mode = #tpu.pipeline_mode<synchronous>, transform_indices = @transform_10, window_bounds = array<i64: 128, 32>}, {pipeline_mode = #tpu.pipeline_mode<synchronous>, transform_indices = @transform_11, window_bounds = array<i64: 1, 32>}, {pipeline_mode = #tpu.pipeline_mode<synchronous>, transform_indices = @transform_12, window_bounds = array<i64: 32, 32>}, {pipeline_mode = #tpu.pipeline_mode<synchronous>, transform_indices = @transform_13, window_bounds = array<i64: 1, 32>}, {pipeline_mode = #tpu.pipeline_mode<synchronous>, transform_indices = @transform_14, window_bounds = array<i64: 32, 32>}, {pipeline_mode = #tpu.pipeline_mode<synchronous>, transform_indices = @transform_15, window_bounds = array<i64: 1, 32>}, {pipeline_mode = #tpu.pipeline_mode<synchronous>, transform_indices = @transform_16, window_bounds = array<i64: 32, 32>}, {pipeline_mode = #tpu.pipeline_mode<synchronous>, transform_indices = @transform_17, window_bounds = array<i64: 1, 32>}, {pipeline_mode = #tpu.pipeline_mode<synchronous>, transform_indices = @transform_18, window_bounds = array<i64: 32, 32>}, {pipeline_mode = #tpu.pipeline_mode<synchronous>, transform_indices = @transform_19, window_bounds = array<i64: 1, 32>}, {pipeline_mode = #tpu.pipeline_mode<synchronous>, transform_indices = @transform_20, window_bounds = array<i64: 1, 32>}, {pipeline_mode = #tpu.pipeline_mode<synchronous>, transform_indices = @transform_21, window_bounds = array<i64: 1, 32>}, {pipeline_mode = #tpu.pipeline_mode<synchronous>, transform_indices = @transform_22, window_bounds = array<i64: 32, 128>}, {pipeline_mode = #tpu.pipeline_mode<synchronous>, transform_indices = @transform_23, window_bounds = array<i64: 1, 128>}, {pipeline_mode = #tpu.pipeline_mode<synchronous>, transform_indices = @transform_24, window_bounds = array<i64: 128, 32>}, {pipeline_mode = #tpu.pipeline_mode<synchronous>, transform_indices = @transform_25, window_bounds = array<i64: 1, 32>}, {pipeline_mode = #tpu.pipeline_mode<synchronous>, transform_indices = @transform_26, window_bounds = array<i64: 32, 128>}, {pipeline_mode = #tpu.pipeline_mode<synchronous>, transform_indices = @transform_27, window_bounds = array<i64: 1, 128>}, {pipeline_mode = #tpu.pipeline_mode<synchronous>, transform_indices = @transform_28, window_bounds = array<i64: 128, 32>}, {pipeline_mode = #tpu.pipeline_mode<synchronous>, transform_indices = @transform_29, window_bounds = array<i64: 1, 32>}, {transform_indices = @transform_30, window_bounds = array<i64: 1, 8, 32>}]} {
    %c0 = arith.constant 0 : index
    %c0_0 = arith.constant 0 : index
    %c0_1 = arith.constant 0 : index
    %0 = vector.load %arg1[%c0, %c0_0, %c0_1] : memref<1x8x32xf32, #tpu.memory_space<vmem>>, vector<1x8x32xf32>
    %1 = vector.shape_cast %0 : vector<1x8x32xf32> to vector<8x32xf32>
    %c0_2 = arith.constant 0 : index
    %c0_3 = arith.constant 0 : index
    %c0_4 = arith.constant 0 : index
    %2 = vector.load %arg2[%c0_2, %c0_3, %c0_4] : memref<1x8x32xf32, #tpu.memory_space<vmem>>, vector<1x8x32xf32>
    %3 = vector.shape_cast %2 : vector<1x8x32xf32> to vector<8x32xf32>
    %c0_5 = arith.constant 0 : index
    %c0_6 = arith.constant 0 : index
    %4 = vector.load %arg3[%c0_5, %c0_6] : memref<1x32xf32, #tpu.memory_space<vmem>>, vector<1x32xf32>
    %c0_7 = arith.constant 0 : index
    %c0_8 = arith.constant 0 : index
    %5 = vector.load %arg4[%c0_7, %c0_8] : memref<1x32xf32, #tpu.memory_space<vmem>>, vector<1x32xf32>
    %cst = arith.constant dense<0.000000e+00> : vector<8xf32>
    %6 = vector.multi_reduction <add>, %1, %cst [1] : vector<8x32xf32> to vector<8xf32>
    %7 = vector.shape_cast %6 : vector<8xf32> to vector<8x1xf32>
    %cst_9 = arith.constant 3.200000e+01 : f32
    %8 = vector.broadcast %cst_9 : f32 to vector<8x1xf32>
    %9 = arith.divf %7, %8 : vector<8x1xf32>
    %10 = vector.broadcast %9 : vector<8x1xf32> to vector<8x32xf32>
    %11 = arith.subf %1, %10 : vector<8x32xf32>
    %12 = arith.mulf %11, %11 : vector<8x32xf32>
    %cst_10 = arith.constant dense<0.000000e+00> : vector<8xf32>
    %13 = vector.multi_reduction <add>, %12, %cst_10 [1] : vector<8x32xf32> to vector<8xf32>
    %14 = vector.shape_cast %13 : vector<8xf32> to vector<8x1xf32>
    %cst_11 = arith.constant 3.200000e+01 : f32
    %15 = vector.broadcast %cst_11 : f32 to vector<8x1xf32>
    %16 = arith.divf %14, %15 : vector<8x1xf32>
    %17 = vector.broadcast %9 : vector<8x1xf32> to vector<8x32xf32>
    %18 = arith.subf %1, %17 : vector<8x32xf32>
    %cst_12 = arith.constant 9.99999974E-6 : f32
    %19 = vector.broadcast %cst_12 : f32 to vector<8x1xf32>
    %20 = arith.addf %16, %19 : vector<8x1xf32>
    %21 = math.rsqrt %20 : vector<8x1xf32>
    %22 = vector.broadcast %21 : vector<8x1xf32> to vector<8x32xf32>
    %23 = arith.mulf %18, %22 : vector<8x32xf32>
    %24 = vector.broadcast %4 : vector<1x32xf32> to vector<8x32xf32>
    %25 = arith.mulf %23, %24 : vector<8x32xf32>
    %26 = vector.broadcast %5 : vector<1x32xf32> to vector<8x32xf32>
    %27 = arith.addf %25, %26 : vector<8x32xf32>
    %c0_13 = arith.constant 0 : index
    %c0_14 = arith.constant 0 : index
    %28 = vector.load %arg5[%c0_13, %c0_14] : memref<32x96xbf16, #tpu.memory_space<vmem>>, vector<32x96xbf16>
    %c0_15 = arith.constant 0 : index
    %c0_16 = arith.constant 0 : index
    %29 = vector.load %arg6[%c0_15, %c0_16] : memref<1x96xf32, #tpu.memory_space<vmem>>, vector<1x96xf32>
    %30 = arith.truncf %27 : vector<8x32xf32> to vector<8x32xbf16>
    %cst_17 = arith.constant dense<0.000000e+00> : vector<8x96xf32>
    %31 = tpu.matmul %30, %28, %cst_17 {dimension_numbers = #tpu.dot_dimension_numbers<[1], [0], [0], [1], [0, 0, 1, 1], [], []>} : vector<8x32xbf16>, vector<32x96xbf16>, vector<8x96xf32> -> vector<8x96xf32>
    %32 = vector.broadcast %29 : vector<1x96xf32> to vector<8x96xf32>
    %33 = arith.addf %31, %32 : vector<8x96xf32>
    %34 = vector.extract_strided_slice %33 {offsets = [0, 0], sizes = [8, 32], strides = [1, 1]} : vector<8x96xf32> to vector<8x32xf32>
    %35 = vector.extract_strided_slice %33 {offsets = [0, 32], sizes = [8, 32], strides = [1, 1]} : vector<8x96xf32> to vector<8x32xf32>
    %36 = vector.extract_strided_slice %33 {offsets = [0, 64], sizes = [8, 32], strides = [1, 1]} : vector<8x96xf32> to vector<8x32xf32>
    %37 = tpu.iota {dimensions = array<i32: 0>} : vector<8x8xi32>
    %38 = tpu.iota {dimensions = array<i32: 1>} : vector<8x8xi32>
    %39 = arith.cmpi sle, %38, %37 : vector<8x8xi32>
    %40 = vector.extract_strided_slice %34 {offsets = [0, 0], sizes = [8, 16], strides = [1, 1]} : vector<8x32xf32> to vector<8x16xf32>
    %41 = arith.truncf %40 : vector<8x16xf32> to vector<8x16xbf16>
    %42 = vector.extract_strided_slice %35 {offsets = [0, 0], sizes = [8, 16], strides = [1, 1]} : vector<8x32xf32> to vector<8x16xf32>
    %43 = arith.truncf %42 : vector<8x16xf32> to vector<8x16xbf16>
    %44 = vector.extract_strided_slice %36 {offsets = [0, 0], sizes = [8, 16], strides = [1, 1]} : vector<8x32xf32> to vector<8x16xf32>
    %45 = arith.truncf %44 : vector<8x16xf32> to vector<8x16xbf16>
    "tpu.trace_start"() <{level = 10 : i32, message = "td,sd->ts"}> : () -> ()
    %cst_18 = arith.constant dense<0.000000e+00> : vector<8x8xf32>
    %46 = tpu.matmul %41, %43, %cst_18 {dimension_numbers = #tpu.dot_dimension_numbers<[1], [1], [0], [0], [0, 0, 1, 0], [], []>} : vector<8x16xbf16>, vector<8x16xbf16>, vector<8x8xf32> -> vector<8x8xf32>
    "tpu.trace_stop"() : () -> ()
    %cst_19 = arith.constant 2.500000e-01 : f32
    %47 = vector.broadcast %cst_19 : f32 to vector<8x8xf32>
    %48 = arith.mulf %46, %47 : vector<8x8xf32>
    %cst_20 = arith.constant -1.000000e+30 : f32
    %49 = vector.broadcast %cst_20 : f32 to vector<8x8xf32>
    %50 = arith.select %39, %48, %49 : vector<8x8xi1>, vector<8x8xf32>
    %cst_21 = arith.constant dense<0xFF800000> : vector<8xf32>
    %51 = vector.multi_reduction <maximumf>, %50, %cst_21 [1] : vector<8x8xf32> to vector<8xf32>
    %52 = vector.shape_cast %51 : vector<8xf32> to vector<8x1xf32>
    %53 = vector.broadcast %52 : vector<8x1xf32> to vector<8x8xf32>
    %54 = arith.subf %50, %53 : vector<8x8xf32>
    %55 = math.exp %54 : vector<8x8xf32>
    %cst_22 = arith.constant dense<0.000000e+00> : vector<8xf32>
    %56 = vector.multi_reduction <add>, %55, %cst_22 [1] : vector<8x8xf32> to vector<8xf32>
    %57 = vector.shape_cast %56 : vector<8xf32> to vector<8x1xf32>
    %58 = tpu.reciprocal %57 {approx = true} : vector<8x1xf32> -> vector<8x1xf32>
    %59 = vector.broadcast %58 : vector<8x1xf32> to vector<8x8xf32>
    %60 = arith.mulf %55, %59 : vector<8x8xf32>
    %61 = arith.truncf %60 : vector<8x8xf32> to vector<8x8xbf16>
    %cst_23 = arith.constant dense<0.000000e+00> : vector<8x16xf32>
    %62 = tpu.matmul %61, %45, %cst_23 {dimension_numbers = #tpu.dot_dimension_numbers<[1], [0], [0], [1], [0, 0, 1, 1], [], []>} : vector<8x8xbf16>, vector<8x16xbf16>, vector<8x16xf32> -> vector<8x16xf32>
    %63 = vector.extract_strided_slice %34 {offsets = [0, 16], sizes = [8, 16], strides = [1, 1]} : vector<8x32xf32> to vector<8x16xf32>
    %64 = arith.truncf %63 : vector<8x16xf32> to vector<8x16xbf16>
    %65 = vector.extract_strided_slice %35 {offsets = [0, 16], sizes = [8, 16], strides = [1, 1]} : vector<8x32xf32> to vector<8x16xf32>
    %66 = arith.truncf %65 : vector<8x16xf32> to vector<8x16xbf16>
    %67 = vector.extract_strided_slice %36 {offsets = [0, 16], sizes = [8, 16], strides = [1, 1]} : vector<8x32xf32> to vector<8x16xf32>
    %68 = arith.truncf %67 : vector<8x16xf32> to vector<8x16xbf16>
    "tpu.trace_start"() <{level = 10 : i32, message = "td,sd->ts"}> : () -> ()
    %cst_24 = arith.constant dense<0.000000e+00> : vector<8x8xf32>
    %69 = tpu.matmul %64, %66, %cst_24 {dimension_numbers = #tpu.dot_dimension_numbers<[1], [1], [0], [0], [0, 0, 1, 0], [], []>} : vector<8x16xbf16>, vector<8x16xbf16>, vector<8x8xf32> -> vector<8x8xf32>
    "tpu.trace_stop"() : () -> ()
    %cst_25 = arith.constant 2.500000e-01 : f32
    %70 = vector.broadcast %cst_25 : f32 to vector<8x8xf32>
    %71 = arith.mulf %69, %70 : vector<8x8xf32>
    %cst_26 = arith.constant -1.000000e+30 : f32
    %72 = vector.broadcast %cst_26 : f32 to vector<8x8xf32>
    %73 = arith.select %39, %71, %72 : vector<8x8xi1>, vector<8x8xf32>
    %cst_27 = arith.constant dense<0xFF800000> : vector<8xf32>
    %74 = vector.multi_reduction <maximumf>, %73, %cst_27 [1] : vector<8x8xf32> to vector<8xf32>
    %75 = vector.shape_cast %74 : vector<8xf32> to vector<8x1xf32>
    %76 = vector.broadcast %75 : vector<8x1xf32> to vector<8x8xf32>
    %77 = arith.subf %73, %76 : vector<8x8xf32>
    %78 = math.exp %77 : vector<8x8xf32>
    %cst_28 = arith.constant dense<0.000000e+00> : vector<8xf32>
    %79 = vector.multi_reduction <add>, %78, %cst_28 [1] : vector<8x8xf32> to vector<8xf32>
    %80 = vector.shape_cast %79 : vector<8xf32> to vector<8x1xf32>
    %81 = tpu.reciprocal %80 {approx = true} : vector<8x1xf32> -> vector<8x1xf32>
    %82 = vector.broadcast %81 : vector<8x1xf32> to vector<8x8xf32>
    %83 = arith.mulf %78, %82 : vector<8x8xf32>
    %84 = arith.truncf %83 : vector<8x8xf32> to vector<8x8xbf16>
    %cst_29 = arith.constant dense<0.000000e+00> : vector<8x16xf32>
    %85 = tpu.matmul %84, %68, %cst_29 {dimension_numbers = #tpu.dot_dimension_numbers<[1], [0], [0], [1], [0, 0, 1, 1], [], []>} : vector<8x8xbf16>, vector<8x16xbf16>, vector<8x16xf32> -> vector<8x16xf32>
    %86 = tpu.concatenate %62, %85 in 1 : vector<8x16xf32>, vector<8x16xf32> -> vector<8x32xf32>
    %c0_30 = arith.constant 0 : index
    %c0_31 = arith.constant 0 : index
    %87 = vector.load %arg7[%c0_30, %c0_31] : memref<32x32xbf16, #tpu.memory_space<vmem>>, vector<32x32xbf16>
    %c0_32 = arith.constant 0 : index
    %c0_33 = arith.constant 0 : index
    %88 = vector.load %arg8[%c0_32, %c0_33] : memref<1x32xf32, #tpu.memory_space<vmem>>, vector<1x32xf32>
    %89 = arith.truncf %86 : vector<8x32xf32> to vector<8x32xbf16>
    %cst_34 = arith.constant dense<0.000000e+00> : vector<8x32xf32>
    %90 = tpu.matmul %89, %87, %cst_34 {dimension_numbers = #tpu.dot_dimension_numbers<[1], [0], [0], [1], [0, 0, 1, 1], [], []>} : vector<8x32xbf16>, vector<32x32xbf16>, vector<8x32xf32> -> vector<8x32xf32>
    %91 = vector.broadcast %88 : vector<1x32xf32> to vector<8x32xf32>
    %92 = arith.addf %90, %91 : vector<8x32xf32>
    %93 = arith.addf %1, %92 : vector<8x32xf32>
    %c0_35 = arith.constant 0 : index
    %c0_36 = arith.constant 0 : index
    %94 = vector.load %arg9[%c0_35, %c0_36] : memref<32x128xbf16, #tpu.memory_space<vmem>>, vector<32x128xbf16>
    %c0_37 = arith.constant 0 : index
    %c0_38 = arith.constant 0 : index
    %95 = vector.load %arg10[%c0_37, %c0_38] : memref<1x128xf32, #tpu.memory_space<vmem>>, vector<1x128xf32>
    %96 = arith.truncf %93 : vector<8x32xf32> to vector<8x32xbf16>
    %cst_39 = arith.constant dense<0.000000e+00> : vector<8x128xf32>
    %97 = tpu.matmul %96, %94, %cst_39 {dimension_numbers = #tpu.dot_dimension_numbers<[1], [0], [0], [1], [0, 0, 1, 1], [], []>} : vector<8x32xbf16>, vector<32x128xbf16>, vector<8x128xf32> -> vector<8x128xf32>
    %98 = vector.broadcast %95 : vector<1x128xf32> to vector<8x128xf32>
    %99 = arith.addf %97, %98 : vector<8x128xf32>
    %cst_40 = arith.constant 5.000000e-01 : f32
    %100 = vector.broadcast %cst_40 : f32 to vector<8x128xf32>
    %101 = arith.mulf %100, %99 : vector<8x128xf32>
    %cst_41 = arith.constant 4.471500e-02 : f32
    %102 = vector.broadcast %cst_41 : f32 to vector<8x128xf32>
    %103 = arith.mulf %102, %99 : vector<8x128xf32>
    %104 = arith.mulf %103, %99 : vector<8x128xf32>
    %105 = arith.mulf %104, %99 : vector<8x128xf32>
    %106 = arith.addf %99, %105 : vector<8x128xf32>
    %cst_42 = arith.constant 0.797884583 : f32
    %107 = vector.broadcast %cst_42 : f32 to vector<8x128xf32>
    %108 = arith.mulf %107, %106 : vector<8x128xf32>
    %109 = math.tanh %108 : vector<8x128xf32>
    %cst_43 = arith.constant 1.000000e+00 : f32
    %110 = vector.broadcast %cst_43 : f32 to vector<8x128xf32>
    %111 = arith.addf %110, %109 : vector<8x128xf32>
    %112 = arith.mulf %101, %111 : vector<8x128xf32>
    %c0_44 = arith.constant 0 : index
    %c0_45 = arith.constant 0 : index
    %113 = vector.load %arg11[%c0_44, %c0_45] : memref<128x32xbf16, #tpu.memory_space<vmem>>, vector<128x32xbf16>
    %c0_46 = arith.constant 0 : index
    %c0_47 = arith.constant 0 : index
    %114 = vector.load %arg12[%c0_46, %c0_47] : memref<1x32xf32, #tpu.memory_space<vmem>>, vector<1x32xf32>
    %115 = arith.truncf %112 : vector<8x128xf32> to vector<8x128xbf16>
    %cst_48 = arith.constant dense<0.000000e+00> : vector<8x32xf32>
    %116 = tpu.matmul %115, %113, %cst_48 {dimension_numbers = #tpu.dot_dimension_numbers<[1], [0], [0], [1], [0, 0, 1, 1], [], []>} : vector<8x128xbf16>, vector<128x32xbf16>, vector<8x32xf32> -> vector<8x32xf32>
    %117 = vector.broadcast %114 : vector<1x32xf32> to vector<8x32xf32>
    %118 = arith.addf %116, %117 : vector<8x32xf32>
    %119 = arith.addf %93, %118 : vector<8x32xf32>
    %c0_49 = arith.constant 0 : index
    %c0_50 = arith.constant 0 : index
    %120 = vector.load %arg13[%c0_49, %c0_50] : memref<32x32xbf16, #tpu.memory_space<vmem>>, vector<32x32xbf16>
    %c0_51 = arith.constant 0 : index
    %c0_52 = arith.constant 0 : index
    %121 = vector.load %arg14[%c0_51, %c0_52] : memref<1x32xf32, #tpu.memory_space<vmem>>, vector<1x32xf32>
    %122 = arith.truncf %119 : vector<8x32xf32> to vector<8x32xbf16>
    %cst_53 = arith.constant dense<0.000000e+00> : vector<8x32xf32>
    %123 = tpu.matmul %122, %120, %cst_53 {dimension_numbers = #tpu.dot_dimension_numbers<[1], [0], [0], [1], [0, 0, 1, 1], [], []>} : vector<8x32xbf16>, vector<32x32xbf16>, vector<8x32xf32> -> vector<8x32xf32>
    %124 = vector.broadcast %121 : vector<1x32xf32> to vector<8x32xf32>
    %125 = arith.addf %123, %124 : vector<8x32xf32>
    %c0_54 = arith.constant 0 : index
    %c0_55 = arith.constant 0 : index
    %126 = vector.load %arg15[%c0_54, %c0_55] : memref<32x32xbf16, #tpu.memory_space<vmem>>, vector<32x32xbf16>
    %c0_56 = arith.constant 0 : index
    %c0_57 = arith.constant 0 : index
    %127 = vector.load %arg16[%c0_56, %c0_57] : memref<1x32xf32, #tpu.memory_space<vmem>>, vector<1x32xf32>
    %128 = arith.truncf %3 : vector<8x32xf32> to vector<8x32xbf16>
    %cst_58 = arith.constant dense<0.000000e+00> : vector<8x32xf32>
    %129 = tpu.matmul %128, %126, %cst_58 {dimension_numbers = #tpu.dot_dimension_numbers<[1], [0], [0], [1], [0, 0, 1, 1], [], []>} : vector<8x32xbf16>, vector<32x32xbf16>, vector<8x32xf32> -> vector<8x32xf32>
    %130 = vector.broadcast %127 : vector<1x32xf32> to vector<8x32xf32>
    %131 = arith.addf %129, %130 : vector<8x32xf32>
    %c0_59 = arith.constant 0 : index
    %c0_60 = arith.constant 0 : index
    %132 = vector.load %arg17[%c0_59, %c0_60] : memref<32x32xbf16, #tpu.memory_space<vmem>>, vector<32x32xbf16>
    %c0_61 = arith.constant 0 : index
    %c0_62 = arith.constant 0 : index
    %133 = vector.load %arg18[%c0_61, %c0_62] : memref<1x32xf32, #tpu.memory_space<vmem>>, vector<1x32xf32>
    %134 = arith.truncf %3 : vector<8x32xf32> to vector<8x32xbf16>
    %cst_63 = arith.constant dense<0.000000e+00> : vector<8x32xf32>
    %135 = tpu.matmul %134, %132, %cst_63 {dimension_numbers = #tpu.dot_dimension_numbers<[1], [0], [0], [1], [0, 0, 1, 1], [], []>} : vector<8x32xbf16>, vector<32x32xbf16>, vector<8x32xf32> -> vector<8x32xf32>
    %136 = vector.broadcast %133 : vector<1x32xf32> to vector<8x32xf32>
    %137 = arith.addf %135, %136 : vector<8x32xf32>
    %138 = vector.extract_strided_slice %125 {offsets = [0, 0], sizes = [8, 16], strides = [1, 1]} : vector<8x32xf32> to vector<8x16xf32>
    %139 = arith.truncf %138 : vector<8x16xf32> to vector<8x16xbf16>
    %140 = vector.extract_strided_slice %131 {offsets = [0, 0], sizes = [8, 16], strides = [1, 1]} : vector<8x32xf32> to vector<8x16xf32>
    %141 = arith.truncf %140 : vector<8x16xf32> to vector<8x16xbf16>
    %142 = vector.extract_strided_slice %137 {offsets = [0, 0], sizes = [8, 16], strides = [1, 1]} : vector<8x32xf32> to vector<8x16xf32>
    %143 = arith.truncf %142 : vector<8x16xf32> to vector<8x16xbf16>
    "tpu.trace_start"() <{level = 10 : i32, message = "td,sd->ts"}> : () -> ()
    %cst_64 = arith.constant dense<0.000000e+00> : vector<8x8xf32>
    %144 = tpu.matmul %139, %141, %cst_64 {dimension_numbers = #tpu.dot_dimension_numbers<[1], [1], [0], [0], [0, 0, 1, 0], [], []>} : vector<8x16xbf16>, vector<8x16xbf16>, vector<8x8xf32> -> vector<8x8xf32>
    "tpu.trace_stop"() : () -> ()
    %cst_65 = arith.constant 2.500000e-01 : f32
    %145 = vector.broadcast %cst_65 : f32 to vector<8x8xf32>
    %146 = arith.mulf %144, %145 : vector<8x8xf32>
    %cst_66 = arith.constant dense<0xFF800000> : vector<8xf32>
    %147 = vector.multi_reduction <maximumf>, %146, %cst_66 [1] : vector<8x8xf32> to vector<8xf32>
    %148 = vector.shape_cast %147 : vector<8xf32> to vector<8x1xf32>
    %149 = vector.broadcast %148 : vector<8x1xf32> to vector<8x8xf32>
    %150 = arith.subf %146, %149 : vector<8x8xf32>
    %151 = math.exp %150 : vector<8x8xf32>
    %cst_67 = arith.constant dense<0.000000e+00> : vector<8xf32>
    %152 = vector.multi_reduction <add>, %151, %cst_67 [1] : vector<8x8xf32> to vector<8xf32>
    %153 = vector.shape_cast %152 : vector<8xf32> to vector<8x1xf32>
    %154 = tpu.reciprocal %153 {approx = true} : vector<8x1xf32> -> vector<8x1xf32>
    %155 = vector.broadcast %154 : vector<8x1xf32> to vector<8x8xf32>
    %156 = arith.mulf %151, %155 : vector<8x8xf32>
    %157 = arith.truncf %156 : vector<8x8xf32> to vector<8x8xbf16>
    %cst_68 = arith.constant dense<0.000000e+00> : vector<8x16xf32>
    %158 = tpu.matmul %157, %143, %cst_68 {dimension_numbers = #tpu.dot_dimension_numbers<[1], [0], [0], [1], [0, 0, 1, 1], [], []>} : vector<8x8xbf16>, vector<8x16xbf16>, vector<8x16xf32> -> vector<8x16xf32>
    %159 = vector.extract_strided_slice %125 {offsets = [0, 16], sizes = [8, 16], strides = [1, 1]} : vector<8x32xf32> to vector<8x16xf32>
    %160 = arith.truncf %159 : vector<8x16xf32> to vector<8x16xbf16>
    %161 = vector.extract_strided_slice %131 {offsets = [0, 16], sizes = [8, 16], strides = [1, 1]} : vector<8x32xf32> to vector<8x16xf32>
    %162 = arith.truncf %161 : vector<8x16xf32> to vector<8x16xbf16>
    %163 = vector.extract_strided_slice %137 {offsets = [0, 16], sizes = [8, 16], strides = [1, 1]} : vector<8x32xf32> to vector<8x16xf32>
    %164 = arith.truncf %163 : vector<8x16xf32> to vector<8x16xbf16>
    "tpu.trace_start"() <{level = 10 : i32, message = "td,sd->ts"}> : () -> ()
    %cst_69 = arith.constant dense<0.000000e+00> : vector<8x8xf32>
    %165 = tpu.matmul %160, %162, %cst_69 {dimension_numbers = #tpu.dot_dimension_numbers<[1], [1], [0], [0], [0, 0, 1, 0], [], []>} : vector<8x16xbf16>, vector<8x16xbf16>, vector<8x8xf32> -> vector<8x8xf32>
    "tpu.trace_stop"() : () -> ()
    %cst_70 = arith.constant 2.500000e-01 : f32
    %166 = vector.broadcast %cst_70 : f32 to vector<8x8xf32>
    %167 = arith.mulf %165, %166 : vector<8x8xf32>
    %cst_71 = arith.constant dense<0xFF800000> : vector<8xf32>
    %168 = vector.multi_reduction <maximumf>, %167, %cst_71 [1] : vector<8x8xf32> to vector<8xf32>
    %169 = vector.shape_cast %168 : vector<8xf32> to vector<8x1xf32>
    %170 = vector.broadcast %169 : vector<8x1xf32> to vector<8x8xf32>
    %171 = arith.subf %167, %170 : vector<8x8xf32>
    %172 = math.exp %171 : vector<8x8xf32>
    %cst_72 = arith.constant dense<0.000000e+00> : vector<8xf32>
    %173 = vector.multi_reduction <add>, %172, %cst_72 [1] : vector<8x8xf32> to vector<8xf32>
    %174 = vector.shape_cast %173 : vector<8xf32> to vector<8x1xf32>
    %175 = tpu.reciprocal %174 {approx = true} : vector<8x1xf32> -> vector<8x1xf32>
    %176 = vector.broadcast %175 : vector<8x1xf32> to vector<8x8xf32>
    %177 = arith.mulf %172, %176 : vector<8x8xf32>
    %178 = arith.truncf %177 : vector<8x8xf32> to vector<8x8xbf16>
    %cst_73 = arith.constant dense<0.000000e+00> : vector<8x16xf32>
    %179 = tpu.matmul %178, %164, %cst_73 {dimension_numbers = #tpu.dot_dimension_numbers<[1], [0], [0], [1], [0, 0, 1, 1], [], []>} : vector<8x8xbf16>, vector<8x16xbf16>, vector<8x16xf32> -> vector<8x16xf32>
    %180 = tpu.concatenate %158, %179 in 1 : vector<8x16xf32>, vector<8x16xf32> -> vector<8x32xf32>
    %c0_74 = arith.constant 0 : index
    %c0_75 = arith.constant 0 : index
    %181 = vector.load %arg19[%c0_74, %c0_75] : memref<32x32xbf16, #tpu.memory_space<vmem>>, vector<32x32xbf16>
    %c0_76 = arith.constant 0 : index
    %c0_77 = arith.constant 0 : index
    %182 = vector.load %arg20[%c0_76, %c0_77] : memref<1x32xf32, #tpu.memory_space<vmem>>, vector<1x32xf32>
    %183 = arith.truncf %180 : vector<8x32xf32> to vector<8x32xbf16>
    %cst_78 = arith.constant dense<0.000000e+00> : vector<8x32xf32>
    %184 = tpu.matmul %183, %181, %cst_78 {dimension_numbers = #tpu.dot_dimension_numbers<[1], [0], [0], [1], [0, 0, 1, 1], [], []>} : vector<8x32xbf16>, vector<32x32xbf16>, vector<8x32xf32> -> vector<8x32xf32>
    %185 = vector.broadcast %182 : vector<1x32xf32> to vector<8x32xf32>
    %186 = arith.addf %184, %185 : vector<8x32xf32>
    %187 = arith.addf %119, %186 : vector<8x32xf32>
    %c0_79 = arith.constant 0 : index
    %c0_80 = arith.constant 0 : index
    %188 = vector.load %arg21[%c0_79, %c0_80] : memref<1x32xf32, #tpu.memory_space<vmem>>, vector<1x32xf32>
    %c0_81 = arith.constant 0 : index
    %c0_82 = arith.constant 0 : index
    %189 = vector.load %arg22[%c0_81, %c0_82] : memref<1x32xf32, #tpu.memory_space<vmem>>, vector<1x32xf32>
    %cst_83 = arith.constant dense<0.000000e+00> : vector<8xf32>
    %190 = vector.multi_reduction <add>, %187, %cst_83 [1] : vector<8x32xf32> to vector<8xf32>
    %191 = vector.shape_cast %190 : vector<8xf32> to vector<8x1xf32>
    %cst_84 = arith.constant 3.200000e+01 : f32
    %192 = vector.broadcast %cst_84 : f32 to vector<8x1xf32>
    %193 = arith.divf %191, %192 : vector<8x1xf32>
    %194 = vector.broadcast %193 : vector<8x1xf32> to vector<8x32xf32>
    %195 = arith.subf %187, %194 : vector<8x32xf32>
    %196 = arith.mulf %195, %195 : vector<8x32xf32>
    %cst_85 = arith.constant dense<0.000000e+00> : vector<8xf32>
    %197 = vector.multi_reduction <add>, %196, %cst_85 [1] : vector<8x32xf32> to vector<8xf32>
    %198 = vector.shape_cast %197 : vector<8xf32> to vector<8x1xf32>
    %cst_86 = arith.constant 3.200000e+01 : f32
    %199 = vector.broadcast %cst_86 : f32 to vector<8x1xf32>
    %200 = arith.divf %198, %199 : vector<8x1xf32>
    %201 = vector.broadcast %193 : vector<8x1xf32> to vector<8x32xf32>
    %202 = arith.subf %187, %201 : vector<8x32xf32>
    %cst_87 = arith.constant 9.99999974E-6 : f32
    %203 = vector.broadcast %cst_87 : f32 to vector<8x1xf32>
    %204 = arith.addf %200, %203 : vector<8x1xf32>
    %205 = math.rsqrt %204 : vector<8x1xf32>
    %206 = vector.broadcast %205 : vector<8x1xf32> to vector<8x32xf32>
    %207 = arith.mulf %202, %206 : vector<8x32xf32>
    %208 = vector.broadcast %188 : vector<1x32xf32> to vector<8x32xf32>
    %209 = arith.mulf %207, %208 : vector<8x32xf32>
    %210 = vector.broadcast %189 : vector<1x32xf32> to vector<8x32xf32>
    %211 = arith.addf %209, %210 : vector<8x32xf32>
    %c0_88 = arith.constant 0 : index
    %c0_89 = arith.constant 0 : index
    %212 = vector.load %arg23[%c0_88, %c0_89] : memref<32x128xbf16, #tpu.memory_space<vmem>>, vector<32x128xbf16>
    %c0_90 = arith.constant 0 : index
    %c0_91 = arith.constant 0 : index
    %213 = vector.load %arg24[%c0_90, %c0_91] : memref<1x128xf32, #tpu.memory_space<vmem>>, vector<1x128xf32>
    %214 = arith.truncf %211 : vector<8x32xf32> to vector<8x32xbf16>
    %cst_92 = arith.constant dense<0.000000e+00> : vector<8x128xf32>
    %215 = tpu.matmul %214, %212, %cst_92 {dimension_numbers = #tpu.dot_dimension_numbers<[1], [0], [0], [1], [0, 0, 1, 1], [], []>} : vector<8x32xbf16>, vector<32x128xbf16>, vector<8x128xf32> -> vector<8x128xf32>
    %216 = vector.broadcast %213 : vector<1x128xf32> to vector<8x128xf32>
    %217 = arith.addf %215, %216 : vector<8x128xf32>
    %cst_93 = arith.constant 5.000000e-01 : f32
    %218 = vector.broadcast %cst_93 : f32 to vector<8x128xf32>
    %219 = arith.mulf %218, %217 : vector<8x128xf32>
    %cst_94 = arith.constant 4.471500e-02 : f32
    %220 = vector.broadcast %cst_94 : f32 to vector<8x128xf32>
    %221 = arith.mulf %220, %217 : vector<8x128xf32>
    %222 = arith.mulf %221, %217 : vector<8x128xf32>
    %223 = arith.mulf %222, %217 : vector<8x128xf32>
    %224 = arith.addf %217, %223 : vector<8x128xf32>
    %cst_95 = arith.constant 0.797884583 : f32
    %225 = vector.broadcast %cst_95 : f32 to vector<8x128xf32>
    %226 = arith.mulf %225, %224 : vector<8x128xf32>
    %227 = math.tanh %226 : vector<8x128xf32>
    %cst_96 = arith.constant 1.000000e+00 : f32
    %228 = vector.broadcast %cst_96 : f32 to vector<8x128xf32>
    %229 = arith.addf %228, %227 : vector<8x128xf32>
    %230 = arith.mulf %219, %229 : vector<8x128xf32>
    %c0_97 = arith.constant 0 : index
    %c0_98 = arith.constant 0 : index
    %231 = vector.load %arg25[%c0_97, %c0_98] : memref<128x32xbf16, #tpu.memory_space<vmem>>, vector<128x32xbf16>
    %c0_99 = arith.constant 0 : index
    %c0_100 = arith.constant 0 : index
    %232 = vector.load %arg26[%c0_99, %c0_100] : memref<1x32xf32, #tpu.memory_space<vmem>>, vector<1x32xf32>
    %233 = arith.truncf %230 : vector<8x128xf32> to vector<8x128xbf16>
    %cst_101 = arith.constant dense<0.000000e+00> : vector<8x32xf32>
    %234 = tpu.matmul %233, %231, %cst_101 {dimension_numbers = #tpu.dot_dimension_numbers<[1], [0], [0], [1], [0, 0, 1, 1], [], []>} : vector<8x128xbf16>, vector<128x32xbf16>, vector<8x32xf32> -> vector<8x32xf32>
    %235 = vector.broadcast %232 : vector<1x32xf32> to vector<8x32xf32>
    %236 = arith.addf %234, %235 : vector<8x32xf32>
    %237 = arith.addf %187, %236 : vector<8x32xf32>
    %c0_102 = arith.constant 0 : index
    %c0_103 = arith.constant 0 : index
    %238 = vector.load %arg27[%c0_102, %c0_103] : memref<32x128xbf16, #tpu.memory_space<vmem>>, vector<32x128xbf16>
    %c0_104 = arith.constant 0 : index
    %c0_105 = arith.constant 0 : index
    %239 = vector.load %arg28[%c0_104, %c0_105] : memref<1x128xf32, #tpu.memory_space<vmem>>, vector<1x128xf32>
    %240 = arith.truncf %237 : vector<8x32xf32> to vector<8x32xbf16>
    %cst_106 = arith.constant dense<0.000000e+00> : vector<8x128xf32>
    %241 = tpu.matmul %240, %238, %cst_106 {dimension_numbers = #tpu.dot_dimension_numbers<[1], [0], [0], [1], [0, 0, 1, 1], [], []>} : vector<8x32xbf16>, vector<32x128xbf16>, vector<8x128xf32> -> vector<8x128xf32>
    %242 = vector.broadcast %239 : vector<1x128xf32> to vector<8x128xf32>
    %243 = arith.addf %241, %242 : vector<8x128xf32>
    %cst_107 = arith.constant 5.000000e-01 : f32
    %244 = vector.broadcast %cst_107 : f32 to vector<8x128xf32>
    %245 = arith.mulf %244, %243 : vector<8x128xf32>
    %cst_108 = arith.constant 4.471500e-02 : f32
    %246 = vector.broadcast %cst_108 : f32 to vector<8x128xf32>
    %247 = arith.mulf %246, %243 : vector<8x128xf32>
    %248 = arith.mulf %247, %243 : vector<8x128xf32>
    %249 = arith.mulf %248, %243 : vector<8x128xf32>
    %250 = arith.addf %243, %249 : vector<8x128xf32>
    %cst_109 = arith.constant 0.797884583 : f32
    %251 = vector.broadcast %cst_109 : f32 to vector<8x128xf32>
    %252 = arith.mulf %251, %250 : vector<8x128xf32>
    %253 = math.tanh %252 : vector<8x128xf32>
    %cst_110 = arith.constant 1.000000e+00 : f32
    %254 = vector.broadcast %cst_110 : f32 to vector<8x128xf32>
    %255 = arith.addf %254, %253 : vector<8x128xf32>
    %256 = arith.mulf %245, %255 : vector<8x128xf32>
    %c0_111 = arith.constant 0 : index
    %c0_112 = arith.constant 0 : index
    %257 = vector.load %arg29[%c0_111, %c0_112] : memref<128x32xbf16, #tpu.memory_space<vmem>>, vector<128x32xbf16>
    %c0_113 = arith.constant 0 : index
    %c0_114 = arith.constant 0 : index
    %258 = vector.load %arg30[%c0_113, %c0_114] : memref<1x32xf32, #tpu.memory_space<vmem>>, vector<1x32xf32>
    %259 = arith.truncf %256 : vector<8x128xf32> to vector<8x128xbf16>
    %cst_115 = arith.constant dense<0.000000e+00> : vector<8x32xf32>
    %260 = tpu.matmul %259, %257, %cst_115 {dimension_numbers = #tpu.dot_dimension_numbers<[1], [0], [0], [1], [0, 0, 1, 1], [], []>} : vector<8x128xbf16>, vector<128x32xbf16>, vector<8x32xf32> -> vector<8x32xf32>
    %261 = vector.broadcast %258 : vector<1x32xf32> to vector<8x32xf32>
    %262 = arith.addf %260, %261 : vector<8x32xf32>
    %263 = arith.addf %237, %262 : vector<8x32xf32>
    %c0_116 = arith.constant 0 : index
    %c0_117 = arith.constant 0 : index
    %c0_118 = arith.constant 0 : index
    %264 = vector.load %arg31[%c0_116, %c0_117, %c0_118] : memref<1x8x32xf32, #tpu.memory_space<vmem>>, vector<1x8x32xf32>
    %265 = vector.shape_cast %264 : vector<1x8x32xf32> to vector<8x32xf32>
    %266 = vector.shape_cast %263 : vector<8x32xf32> to vector<1x8x32xf32>
    tpu.vector_store %arg31[%c0_116, %c0_117, %c0_118], %266 {strides = array<i32>} : memref<1x8x32xf32, #tpu.memory_space<vmem>>, vector<1x8x32xf32>,
    return
  }
  func.func @transform_0(%arg0: i32) -> (i32, i32, i32) {
    %c0_i32 = arith.constant 0 : i32
    %c0_i32_0 = arith.constant 0 : i32
    %c0_i32_1 = arith.constant 0 : i32
    return %arg0, %c0_i32, %c0_i32_0 : i32, i32, i32
  }
  func.func @transform_1(%arg0: i32) -> (i32, i32, i32) {
    %c0_i32 = arith.constant 0 : i32
    %c0_i32_0 = arith.constant 0 : i32
    %c0_i32_1 = arith.constant 0 : i32
    return %arg0, %c0_i32, %c0_i32_0 : i32, i32, i32
  }
  func.func @transform_2(%arg0: i32) -> (i32, i32) {
    %c0_i32 = arith.constant 0 : i32
    %c0_i32_0 = arith.constant 0 : i32
    %c0_i32_1 = arith.constant 0 : i32
    return %c0_i32, %c0_i32_0 : i32, i32
  }
  func.func @transform_3(%arg0: i32) -> (i32, i32) {
    %c0_i32 = arith.constant 0 : i32
    %c0_i32_0 = arith.constant 0 : i32
    %c0_i32_1 = arith.constant 0 : i32
    return %c0_i32, %c0_i32_0 : i32, i32
  }
  func.func @transform_4(%arg0: i32) -> (i32, i32) {
    %c0_i32 = arith.constant 0 : i32
    %c0_i32_0 = arith.constant 0 : i32
    %c0_i32_1 = arith.constant 0 : i32
    return %c0_i32, %c0_i32_0 : i32, i32
  }
  func.func @transform_5(%arg0: i32) -> (i32, i32) {
    %c0_i32 = arith.constant 0 : i32
    %c0_i32_0 = arith.constant 0 : i32
    %c0_i32_1 = arith.constant 0 : i32
    return %c0_i32, %c0_i32_0 : i32, i32
  }
  func.func @transform_6(%arg0: i32) -> (i32, i32) {
    %c0_i32 = arith.constant 0 : i32
    %c0_i32_0 = arith.constant 0 : i32
    %c0_i32_1 = arith.constant 0 : i32
    return %c0_i32, %c0_i32_0 : i32, i32
  }
  func.func @transform_7(%arg0: i32) -> (i32, i32) {
    %c0_i32 = arith.constant 0 : i32
    %c0_i32_0 = arith.constant 0 : i32
    %c0_i32_1 = arith.constant 0 : i32
    return %c0_i32, %c0_i32_0 : i32, i32
  }
  func.func @transform_8(%arg0: i32) -> (i32, i32) {
    %c0_i32 = arith.constant 0 : i32
    %c0_i32_0 = arith.constant 0 : i32
    %c0_i32_1 = arith.constant 0 : i32
    return %c0_i32, %c0_i32_0 : i32, i32
  }
  func.func @transform_9(%arg0: i32) -> (i32, i32) {
    %c0_i32 = arith.constant 0 : i32
    %c0_i32_0 = arith.constant 0 : i32
    %c0_i32_1 = arith.constant 0 : i32
    return %c0_i32, %c0_i32_0 : i32, i32
  }
  func.func @transform_10(%arg0: i32) -> (i32, i32) {
    %c0_i32 = arith.constant 0 : i32
    %c0_i32_0 = arith.constant 0 : i32
    %c0_i32_1 = arith.constant 0 : i32
    return %c0_i32, %c0_i32_0 : i32, i32
  }
  func.func @transform_11(%arg0: i32) -> (i32, i32) {
    %c0_i32 = arith.constant 0 : i32
    %c0_i32_0 = arith.constant 0 : i32
    %c0_i32_1 = arith.constant 0 : i32
    return %c0_i32, %c0_i32_0 : i32, i32
  }
  func.func @transform_12(%arg0: i32) -> (i32, i32) {
    %c0_i32 = arith.constant 0 : i32
    %c0_i32_0 = arith.constant 0 : i32
    %c0_i32_1 = arith.constant 0 : i32
    return %c0_i32, %c0_i32_0 : i32, i32
  }
  func.func @transform_13(%arg0: i32) -> (i32, i32) {
    %c0_i32 = arith.constant 0 : i32
    %c0_i32_0 = arith.constant 0 : i32
    %c0_i32_1 = arith.constant 0 : i32
    return %c0_i32, %c0_i32_0 : i32, i32
  }
  func.func @transform_14(%arg0: i32) -> (i32, i32) {
    %c0_i32 = arith.constant 0 : i32
    %c0_i32_0 = arith.constant 0 : i32
    %c0_i32_1 = arith.constant 0 : i32
    return %c0_i32, %c0_i32_0 : i32, i32
  }
  func.func @transform_15(%arg0: i32) -> (i32, i32) {
    %c0_i32 = arith.constant 0 : i32
    %c0_i32_0 = arith.constant 0 : i32
    %c0_i32_1 = arith.constant 0 : i32
    return %c0_i32, %c0_i32_0 : i32, i32
  }
  func.func @transform_16(%arg0: i32) -> (i32, i32) {
    %c0_i32 = arith.constant 0 : i32
    %c0_i32_0 = arith.constant 0 : i32
    %c0_i32_1 = arith.constant 0 : i32
    return %c0_i32, %c0_i32_0 : i32, i32
  }
  func.func @transform_17(%arg0: i32) -> (i32, i32) {
    %c0_i32 = arith.constant 0 : i32
    %c0_i32_0 = arith.constant 0 : i32
    %c0_i32_1 = arith.constant 0 : i32
    return %c0_i32, %c0_i32_0 : i32, i32
  }
  func.func @transform_18(%arg0: i32) -> (i32, i32) {
    %c0_i32 = arith.constant 0 : i32
    %c0_i32_0 = arith.constant 0 : i32
    %c0_i32_1 = arith.constant 0 : i32
    return %c0_i32, %c0_i32_0 : i32, i32
  }
  func.func @transform_19(%arg0: i32) -> (i32, i32) {
    %c0_i32 = arith.constant 0 : i32
    %c0_i32_0 = arith.constant 0 : i32
    %c0_i32_1 = arith.constant 0 : i32
    return %c0_i32, %c0_i32_0 : i32, i32
  }
  func.func @transform_20(%arg0: i32) -> (i32, i32) {
    %c0_i32 = arith.constant 0 : i32
    %c0_i32_0 = arith.constant 0 : i32
    %c0_i32_1 = arith.constant 0 : i32
    return %c0_i32, %c0_i32_0 : i32, i32
  }
  func.func @transform_21(%arg0: i32) -> (i32, i32) {
    %c0_i32 = arith.constant 0 : i32
    %c0_i32_0 = arith.constant 0 : i32
    %c0_i32_1 = arith.constant 0 : i32
    return %c0_i32, %c0_i32_0 : i32, i32
  }
  func.func @transform_22(%arg0: i32) -> (i32, i32) {
    %c0_i32 = arith.constant 0 : i32
    %c0_i32_0 = arith.constant 0 : i32
    %c0_i32_1 = arith.constant 0 : i32
    return %c0_i32, %c0_i32_0 : i32, i32
  }
  func.func @transform_23(%arg0: i32) -> (i32, i32) {
    %c0_i32 = arith.constant 0 : i32
    %c0_i32_0 = arith.constant 0 : i32
    %c0_i32_1 = arith.constant 0 : i32
    return %c0_i32, %c0_i32_0 : i32, i32
  }
  func.func @transform_24(%arg0: i32) -> (i32, i32) {
    %c0_i32 = arith.constant 0 : i32
    %c0_i32_0 = arith.constant 0 : i32
    %c0_i32_1 = arith.constant 0 : i32
    return %c0_i32, %c0_i32_0 : i32, i32
  }
  func.func @transform_25(%arg0: i32) -> (i32, i32) {
    %c0_i32 = arith.constant 0 : i32
    %c0_i32_0 = arith.constant 0 : i32
    %c0_i32_1 = arith.constant 0 : i32
    return %c0_i32, %c0_i32_0 : i32, i32
  }
  func.func @transform_26(%arg0: i32) -> (i32, i32) {
    %c0_i32 = arith.constant 0 : i32
    %c0_i32_0 = arith.constant 0 : i32
    %c0_i32_1 = arith.constant 0 : i32
    return %c0_i32, %c0_i32_0 : i32, i32
  }
  func.func @transform_27(%arg0: i32) -> (i32, i32) {
    %c0_i32 = arith.constant 0 : i32
    %c0_i32_0 = arith.constant 0 : i32
    %c0_i32_1 = arith.constant 0 : i32
    return %c0_i32, %c0_i32_0 : i32, i32
  }
  func.func @transform_28(%arg0: i32) -> (i32, i32) {
    %c0_i32 = arith.constant 0 : i32
    %c0_i32_0 = arith.constant 0 : i32
    %c0_i32_1 = arith.constant 0 : i32
    return %c0_i32, %c0_i32_0 : i32, i32
  }
  func.func @transform_29(%arg0: i32) -> (i32, i32) {
    %c0_i32 = arith.constant 0 : i32
    %c0_i32_0 = arith.constant 0 : i32
    %c0_i32_1 = arith.constant 0 : i32
    return %c0_i32, %c0_i32_0 : i32, i32
  }
  func.func @transform_30(%arg0: i32) -> (i32, i32, i32) {
    %c0_i32 = arith.constant 0 : i32
    %c0_i32_0 = arith.constant 0 : i32
    %c0_i32_1 = arith.constant 0 : i32
    return %arg0, %c0_i32, %c0_i32_0 : i32, i32, i32
  }
}

</mosaic_0001>

<bundles_post_ra>
// kernel: block_forward.1
= control target key start
LH: loop header
LB: loop body
LE: loop exit
PB: predicated region body
PF: predicated region fallthrough
CT: control target
= control target key end

     0   :  { %s3096_s6 = smov 1   ;;  %s3097_s10 = smov 2   ;;  %s3603_s0 = inlined_call_operand.smem [shape: u32[31], index: -1, kind: input, shape index: {}] }
   0x1   :  { %s3143_s5 = sld [smem:[%s3603_s0]]   ;;  %s3098_s14 = smov 3  }
   0x2   :  { %s3148_s9 = sld [smem:[%s3603_s0 + %s3096_s6]]   ;;  %s3099_s18 = smov 4  }
   0x3   :  { %s3153_s13 = sld [smem:[%s3603_s0 + %s3097_s10]]   ;;  %s3100_s22 = smov 5  }
   0x4   :  { %s3158_s17 = sld [smem:[%s3603_s0 + %s3098_s14]]   ;;  %s3101_s26 = smov 6  }
   0x5   :  { %s3163_s21 = sld [smem:[%s3603_s0 + %s3099_s18]]   ;;  %s3102_s30 = smov 7  }
   0x6   :  { %s3168_s25 = sld [smem:[%s3603_s0 + %s3100_s22]]   ;;  %s3103_s4 = smov 8  }
   0x7   :  { %3618 = sst [smem:[#allocation5_spill]] %s3143_s5  ;;  %s3104_s10 = smov 9  }
   0x8   :  { %3619 = sst [smem:[#allocation6_spill]] %s3148_s9  ;;  %s3105_s15 = smov 10  }
   0x9   :  { %s3173_s29 = sld [smem:[%s3603_s0 + %s3101_s26]]   ;;  %s3106_s20 = smov 11  }
   0xa   :  { %s3178_s3 = sld [smem:[%s3603_s0 + %s3102_s30]]   ;;  %s3107_s26 = smov 12  }
   0xb   :  { %s3183_s8 = sld [smem:[%s3603_s0 + %s3103_s4]]   ;;  %s3108_s1 = smov 13  }
   0xc   :  { %s3188_s14 = sld [smem:[%s3603_s0 + %s3104_s10]]   ;;  %s3109_s7 = smov 14  }
   0xd   :  { %s3193_s19 = sld [smem:[%s3603_s0 + %s3105_s15]]   ;;  %s3110_s15 = smov 15  }
   0xe   :  { %s3198_s24 = sld [smem:[%s3603_s0 + %s3106_s20]]   ;;  %s3111_s22 = smov 16  }
   0xf   :  { %s3203_s30 = sld [smem:[%s3603_s0 + %s3107_s26]]   ;;  %s3112_s28 = smov 17  }
  0x10   :  { %3620 = sst [smem:[#allocation7_spill]] %s3178_s3 }
  0x11   :  { %3621 = sst [smem:[#allocation8_spill]] %s3183_s8 }
  0x12   :  { %s3208_s6 = sld [smem:[%s3603_s0 + %s3108_s1]]  }
  0x13   :  { %s3213_s12 = sld [smem:[%s3603_s0 + %s3109_s7]]   ;;  %s3113_s7 = smov 18  }
  0x14   :  { %s3218_s20 = sld [smem:[%s3603_s0 + %s3110_s15]]   ;;  %s3114_s15 = smov 19  }
  0x15   :  { %s3223_s27 = sld [smem:[%s3603_s0 + %s3111_s22]]   ;;  %s3115_s22 = smov 20  }
  0x16   :  { %s3228_s4 = sld [smem:[%s3603_s0 + %s3112_s28]]   ;;  %s3116_s28 = smov 21  }
  0x18   :  { %3622 = sst [smem:[#allocation9_spill]] %s3208_s6 }
  0x19   :  { %s3233_s6 = sld [smem:[%s3603_s0 + %s3113_s7]]   ;;  %s3117_s7 = smov 22  }
  0x1a   :  { %3623 = sst [smem:[#allocation10_spill]] %s3218_s20 }
  0x1b   :  { %3624 = sst [smem:[#allocation11_spill]] %s3223_s27 }
  0x1c   :  { %3625 = sst [smem:[#allocation12_spill]] %s3228_s4 }
  0x1d   :  { %s3238_s20 = sld [smem:[%s3603_s0 + %s3114_s15]]   ;;  %s3118_s15 = smov 23  }
  0x1e   :  { %s3243_s27 = sld [smem:[%s3603_s0 + %s3115_s22]]   ;;  %s3119_s22 = smov 24  }
  0x1f   :  { %3626 = sst [smem:[#allocation13_spill]] %s3233_s6 }
  0x20   :  { %s3248_s4 = sld [smem:[%s3603_s0 + %s3116_s28]]   ;;  %s3120_s28 = smov 25  }
  0x21   :  { %s3253_s6 = sld [smem:[%s3603_s0 + %s3117_s7]]   ;;  %s3121_s7 = smov 26  }
  0x23   :  { %3627 = sst [smem:[#allocation14_spill]] %s3238_s20 }
  0x24   :  { %3628 = sst [smem:[#allocation15_spill]] %s3243_s27 }
  0x25   :  { %s3258_s20 = sld [smem:[%s3603_s0 + %s3118_s15]]   ;;  %s3122_s15 = smov 27  }
  0x26   :  { %3629 = sst [smem:[#allocation16_spill]] %s3248_s4 }
  0x27   :  { %3630 = sst [smem:[#allocation17_spill]] %s3253_s6 }
  0x28   :  { %s3263_s27 = sld [smem:[%s3603_s0 + %s3119_s22]]   ;;  %s3123_s22 = smov 28  }
  0x29   :  { %s3268_s4 = sld [smem:[%s3603_s0 + %s3120_s28]]   ;;  %s3124_s28 = smov 29  }
  0x2a   :  { %s3273_s6 = sld [smem:[%s3603_s0 + %s3121_s7]]   ;;  %s3125_s7 = smov 30  }
  0x2b   :  { %3631 = sst [smem:[#allocation18_spill]] %s3258_s20 }
  0x2c   :  { %s3278_s20 = sld [smem:[%s3603_s0 + %s3122_s15]]  }
  0x2e   :  { %3632 = sst [smem:[#allocation19_spill]] %s3263_s27 }
  0x2f   :  { %3633 = sst [smem:[#allocation20_spill]] %s3268_s4 }
  0x30   :  { %3634 = sst [smem:[#allocation21_spill]] %s3273_s6 }
  0x31   :  { %s3283_s27 = sld [smem:[%s3603_s0 + %s3123_s22]]  }
  0x32   :  { %s3288_s4 = sld [smem:[%s3603_s0 + %s3124_s28]]  }
  0x33   :  { %s3293_s6 = sld [smem:[%s3603_s0 + %s3125_s7]]  }
  0x38   :  { %3635 = sst [smem:[#allocation22_spill]] %s3288_s4 }
  0x39   :  { %66 = vsyncpa [#allocation3], 0 }
  0x3a   :  { %68 = vsyncpa [#allocation3 + $0x1], 0  ;;  %s3295_s15 = smov 0   ;;  %s3297_s16 = smov 0  }
  0x3b   :  { %s3299_s18 = smov 0   ;;  %s3301_s22 = smov 0  }
  0x3c LB: > { %s3636_s8 = sld [smem:[#allocation8_spill]]  ;;  %s3316_s0 = sadd.s32 4294967295, %s3094_s22   ;;  %s3082_s15 = sphi %s3295_s15, %s3659_s15   ;;  %s3094_s22 = sphi %s3301_s22, %s3662_s22   ;;  %s3090_s18 = sphi %s3299_s18, %s3661_s18   ;;  %s3086_s16 = sphi %s3297_s16, %s3660_s16  }
  0x3d   : > { %s2553_s23 = sadd.s32 4294967294, %s3094_s22   ;;  %s3320_s26 = sadd.s32 1, %s3094_s22  }
  0x3e   : > { %s721_s28 = sadd.s32 1, %s3090_s18  ;;  %s718_s1 = ssub.s32 %s3094_s22, %s3320_s26 }
  0x3f   : > { %p731_p0 = scmp.ne.s32.totalorder %s3090_s18, %s3086_s16  ;;  %p719_p1 = scmp.eq.s32.totalorder %s718_s1, 0 }
  0x40   : > { %p732_p2 = scmp.eq.s32.totalorder %s3316_s0, 1  ;;  %p737_p3 = scmp.ne.s32.totalorder %s3086_s16, %s3082_s15 }
  0x41   : > { %p738_p4 = scmp.eq.s32.totalorder %s2553_s23, 1  ;;  %p2556_p7 = scmp.ge.s32.totalorder %s3094_s22, 1 }
  0x42   : > { %s3331_s2 = scalar_select %p719_p1, %s3090_s18, %s721_s28  }
  0x43   : > { %p3333_p5 = por %p732_p2, %p731_p0  ;;  %p3337_p6 = por %p738_p4, %p737_p3 }
  0x44   : > { %p854_p8 = scmp.lt.s32.totalorder %s3094_s22, 3 }
  0x46   : > { %p855_p9 = pnand %p2556_p7, %p854_p8 }
  0x47   : > { %s3639_s5 = sld [smem:[#allocation5_spill]] (!%p855_p9)  ;;  %p935_p10 = scmp.lt.s32.totalorder (!%p855_p9), %s3316_s0, 1 }
  0x48   : > { %858 = sbr.rel (%p855_p9) target bundleno = 4679 (0x1247), region = 140  ;;  %s3611_s1 = smov (!%p855_p9), 112  }
  0x49   : > { %s3640_s3 = sld [smem:[#allocation7_spill]] (!%p855_p9) }
  0x4a   : > { %s3641_s9 = sld [smem:[#allocation6_spill]] (!%p855_p9) }
  0x4b   : > { %s3658_s4 = sld [smem:[#allocation22_spill]] (!%p855_p9) }
  0x4d   : > { %s3345_s11 = scalar_select %p935_p10, %s3316_s0, 1  ;;  %vm948_vm0 = vcmask 261120   ;;  %v2966_v7 = vld [vmem:[%s3163_s21 + $0x8] sm:$0xff]   ;;  %v3126_v8 = vmov 0.0   ;;  %vm3127_vm1 = vmmov 0   ;;  %v2967_v9 = vld [vmem:[%s3163_s21] sm:$0xff]   ;;  %v1044_v32 = vlaneseq }
  0x4e   : > { %2709 = vmatprep.subr.bf16.mxu0 %v3126_v8  ;;  %2713 = vmatprep.mubr.msk.bf16.mxu0 %vm3127_vm1, %v3126_v8  ;;  %v2560_v14 = vld [vmem:[%s3153_s13] ss:$0 sm:$0xff]  ;;  %vm1053_vm2 = vcmask 130048   ;;  %vm1102_vm4 = vcmask 64512   ;;  %vm1120_vm5 = vcmask 1043456  }
  0x4f   : > { %s3609_s23 = sshll.u32 %s3345_s11, 3  ;;  %2710 = vmatpush3.bf16.msra.mxu0 %v2966_v7  ;;  %2717 = vmatprep.subr.bf16.mxu1 %v3126_v8  ;;  %v2561_v16 = vld [vmem:[%s3158_s17] ss:$0 sm:$0xff]  ;;  %v1045_v33 = vshrl.u32 %v1044_v32, 7  ;;  %v1047_v34 = vand.u32 127, %v1044_v32  ;;  %v2972_v32 = vld [vmem:[%s3193_s19 + $0x38] sm:$0xff]  }
  0x50   : > { %s938_s28 = scalar_lea.vmem %s3639_s5, %s3609_s23  ;;  %2711 = vmatprep.subr.bf16.mxu0 %v3126_v8  ;;  %2719 = vmatprep.mubr.msk.bf16.mxu1 %vm3127_vm1, %v3126_v8  ;;  %v2562_v20 = vld [vmem:[%s3168_s25] ss:$0 sm:$0xff]  ;;  %s3130_s23 = smov 80  }
  0x51   : > { %v3351_v0 = vld [vmem:[%s938_s28] sm:$0xff]  ;;  %s3129_s28 = smov 96   ;;  %vm1048_vm3 = vcmp.le.s32.totalorder %v1047_v34, %v1045_v33  ;;  %v2973_v33 = vld [vmem:[%s3193_s19 + $0x30] sm:$0xff]   ;;  %s3654_s5 = sld [smem:[#allocation19_spill]] }
  0x52   : > { %v949_v1 = vsel %vm948_vm0, %v3351_v0, 0.0  ;;  %v2975_v34 = vld [vmem:[%s3193_s19 + $0x20] sm:$0xff]  }
  0x53   : > { %950 = vadd.xlane.f32.xlu0 %v949_v1  ;;  %2712 = vmatpush3.bf16.msra.mxu0 %v2967_v9  ;;  %v2968_v9 = vld [vmem:[%s3173_s29 + $0x8] sm:$0xff]  }
  0x54   : > { %2723 = vmatprep.subr.bf16.mxu0 %v3126_v8 }
  0xdc   : > { %v951_v2 = vpop.xlane.xlu0 %950 }
  0xdd   : > { %v953_v3 = vmul.f32 0.03125, %v951_v2 }
  0xdf   : > { %v954_v4 = vsub.f32 %v3351_v0, %v953_v3 }
  0xe1   : > { %v955_v5 = vmul.f32 %v954_v4, %v954_v4 }
  0xe3   : > { %v956_v6 = vsel %vm948_vm0, %v955_v5, 0.0 }
  0xe4   : > { %957 = vadd.xlane.f32.xlu0 %v956_v6 }
 0x16d   : > { %v958_v10 = vpop.xlane.xlu0 %957 }
 0x16e   : > { %v959_v11 = vmul.f32 0.03125, %v958_v10  ;;  %v2969_v10 = vld [vmem:[%s3173_s29] sm:$0xff]  }
 0x170   : > { %v960_v12 = vadd.f32 1e-05, %v959_v11 }
 0x172   : > { %3008 = vrsqrt.f32 %v960_v12 }
 0x17f   : > { %v3009_v13 = vpop.eup %3008 }
 0x180   : > { %v962_v15 = vmul.f32 %v3009_v13, %v954_v4 }
 0x182   : > { %v969_v17 = vmul.f32 %v2560_v14, %v962_v15 }
 0x184   : > { %v976_v18 = vadd.f32 %v2561_v16, %v969_v17 }
 0x186   : > { %v982_v19 = vpack.c.bf16 %v976_v18, %v976_v18 }
 0x188   : > { %2714 = vmatmul.mubr.msk.bf16.vlgmr.msra.gmra.mxu0 %vm948_vm0, %v982_v19 }
 0x189   : > { %2725 = vmatprep.mubr.msk.bf16.mxu0 %vm3127_vm1, %v3126_v8 }
 0x248   : > { %v1038_v21 = vpop.f32.mrf.mxu0 }
 0x249   : > { %v1039_v22 = vadd.f32 %v2562_v20, %v1038_v21 }
 0x24a   : > { %v2715_v23 = vpop.f32.mrf.mxu0 }
 0x24b   : > { %v1049_v24 = vpack.c.bf16 %v1039_v22, %v1039_v22  ;;  %v2970_v22 = vld [vmem:[%s3636_s8 + $0x8] sm:$0xff]   ;;  %v2971_v23 = vld [vmem:[%s3636_s8] sm:$0xff]  }
 0x24c   : > { %v1041_v25 = vpop.f32.mrf.mxu0 }
 0x24d   : > { %1164 = vrot.lane.b32.xlu0 %v1049_v24, %s3611_s1  ;;  %1051 = vrot.lane.b32.xlu1 %v1049_v24, %s3129_s28  ;;  %s3132_s28 = smov 64  }
 0x24e   : > { %v2716_v26 = vpop.f32.mrf.mxu0 }
 0x251   : > { %1166 = vrot.lane.b32.xlu1 %v1049_v24, %s3130_s23  ;;  %s3131_s23 = smov 48  }
 0x2bf   : > { %v1052_v27 = vpop.permute.xlu1 %1051  ;;  %v1165_v31 = vpop.permute.xlu0 %1164 }
 0x2c0   : > { %v1058_v28 = vsel %vm1053_vm2, %v1052_v27, 0 }
 0x2c1   : > { %2718 = vmatpush3.bf16.xpose.msra.mxu1 %v1058_v28 }
 0x2c2   : > { %2729 = vmatprep.subr.bf16.mxu1 %v3126_v8 }
 0x2c3   : > { %v1167_v29 = vpop.permute.xlu1 %1166 }
 0x2c4   : > { %v1172_v30 = vsel %vm1053_vm2, %v1167_v29, 0 }
 0x2c8   : > { %2720 = vmatmul.mubr.msk.bf16.vlgmr.msra.gmra.mxu1 %vm1053_vm2, %v1049_v24 }
 0x2c9   : > { %2730 = vmatpush3.bf16.xpose.msra.mxu1 %v1172_v30  ;;  %2731 = vmatprep.mubr.msk.bf16.mxu1 %vm3127_vm1, %v3126_v8 }
 0x2ca   : > { %2741 = vmatprep.subr.bf16.mxu1 %v3126_v8 }
 0x2d0   : > { %2732 = vmatmul.mubr.msk.bf16.vlgmr.msra.gmra.mxu1 %vm1053_vm2, %v1165_v31 }
 0x2d1   : > { %2745 = vmatprep.mubr.msk.bf16.mxu1 %vm3127_vm1, %v3126_v8  ;;  %2742 = vmatpush3.bf16.msra.mxu1 %v2968_v9 }
 0x2d2   : > { %2743 = vmatprep.subr.bf16.mxu1 %v3126_v8 }
 0x2d5   : > { %2744 = vmatpush3.bf16.msra.mxu1 %v2969_v10 }
 0x2d6   : > { %2757 = vmatprep.subr.bf16.mxu1 %v3126_v8 }
 0x388   : > { %v1094_v35 = vpop.f32.mrf.mxu1 }
 0x389   : > { %v1100_v36 = vmul.f32 0.25, %v1094_v35  ;;  %v2976_v35 = vld [vmem:[%s3193_s19 + $0x18] sm:$0xff]  }
 0x38a   : > { %v2721_v37 = vpop.f32.mrf.mxu1 }
 0x38b   : > { %v1101_v38 = vsel %vm1048_vm3, %v1100_v36, -1e+30  ;;  %v2977_v36 = vld [vmem:[%s3193_s19 + $0x10] sm:$0xff]   ;;  %v2978_v37 = vld [vmem:[%s3193_s19 + $0x8] sm:$0xff]  }
 0x38c   : > { %v1097_v39 = vpop.f32.mrf.mxu1  ;;  %v1103_v40 = vsel %vm1102_vm4, %v1101_v38, -inf }
 0x38d   : > { %1104 = vmax.xlane.f32.xlu1 %v1103_v40  ;;  %v2574_v39 = vld [vmem:[%s3188_s14] ss:$0 sm:$0xff] }
 0x38e   : > { %v2722_v41 = vpop.f32.mrf.mxu1 }
 0x390   : > { %v1208_v42 = vpop.f32.mrf.mxu1 }
 0x391   : > { %v1214_v43 = vmul.f32 0.25, %v1208_v42 }
 0x392   : > { %v2733_v44 = vpop.f32.mrf.mxu1 }
 0x393   : > { %v1215_v45 = vsel %vm1048_vm3, %v1214_v43, -1e+30 }
 0x394   : > { %v1211_v46 = vpop.f32.mrf.mxu1  ;;  %v1216_v47 = vsel %vm1102_vm4, %v1215_v45, -inf }
 0x395   : > { %1217 = vmax.xlane.f32.xlu0 %v1216_v47 }
 0x396   : > { %v2734_v48 = vpop.f32.mrf.mxu1 }
 0x3ab   : > { %1228 = vrot.lane.b32.xlu0 %v1049_v24, %s3131_s23  ;;  %s3610_s23 = smov 16  }
 0x416   : > { %v1105_v49 = vpop.xlane.xlu1 %1104 }
 0x417   : > { %v1106_v50 = vsub.f32 %v1101_v38, %v1105_v49  ;;  %v2979_v38 = vld [vmem:[%s3193_s19] sm:$0xff]  }
 0x419   : > { %v1107_v51 = vmul.f32 1.442695, %v1106_v50 }
 0x41b   : > { %3010 = vpow2.f32 %v1107_v51 }
 0x41e   : > { %v1218_v52 = vpop.xlane.xlu0 %1217 }
 0x41f   : > { %v1219_v53 = vsub.f32 %v1215_v45, %v1218_v52 }
 0x421   : > { %v1220_v54 = vmul.f32 1.442695, %v1219_v53 }
 0x422   : > { %v1229_v2 = vpop.permute.xlu0 %1228 }
 0x423   : > { %3012 = vpow2.f32 %v1220_v54  ;;  %v1234_v4 = vsel %vm1120_vm5, %v1229_v2, 0 }
 0x428   : > { %v3011_v55 = vpop.eup %3010 }
 0x429   : > { %v1109_v56 = vsel %vm1102_vm4, %v3011_v55, 0.0 }
 0x42a   : > { %1110 = vadd.xlane.f32.xlu1 %v1109_v56  ;;  %v2981_v56 = vld [vmem:[%s3203_s30] sm:$0xff]  }
 0x430   : > { %v3013_v57 = vpop.eup %3012 }
 0x431   : > { %v1222_v58 = vsel %vm1102_vm4, %v3013_v57, 0.0 }
 0x432   : > { %1223 = vadd.xlane.f32.xlu1 %v1222_v58 }
 0x443   : > { %1115 = vrot.lane.b32.xlu1 %v1049_v24, %s3132_s28  ;;  %v2570_v24 = vld [vmem:[%s3640_s3] ss:$0 sm:$0xff]  ;;  %s3642_s28 = sld [smem:[#allocation11_spill]]  ;;  %s3647_s3 = smov 112  }
 0x4b3   : > { %v1111_v59 = vpop.xlane.xlu1 %1110 }
 0x4b4   : > { %3014 = vrcp.f32 %v1111_v59 }
 0x4bb   : > { %v1224_v60 = vpop.xlane.xlu1 %1223 }
 0x4bc   : > { %3016 = vrcp.f32 %v1224_v60 }
 0x4bf   : > { %v1116_v61 = vpop.permute.xlu1 %1115 }
 0x4c0   : > { %v1122_v62 = vsel %vm1120_vm5, %v1116_v61, 0 }
 0x4c1   : > { %v3015_v63 = vpop.eup %3014  ;;  %2724 = vmatpush3.bf16.msra.mxu0 %v1122_v62 }
 0x4c2   : > { %2735 = vmatprep.subr.bf16.mxu0 %v3126_v8  ;;  %v1113_v1 = vmul.f32 %v3015_v63, %v3011_v55  ;;  %v2980_v55 = vld [vmem:[%s3203_s30 + $0x8] sm:$0xff]  }
 0x4c3   : > { %v2982_v63 = vld [vmem:[%s3213_s12 + $0x8] sm:$0xff]  }
 0x4c4   : > { %v1114_v3 = vpack.c.bf16 %v1113_v1, %v1113_v1 }
 0x4c6   : > { %2726 = vmatmul.mubr.msk.bf16.vlgmr.msra.gmra.mxu0 %vm1102_vm4, %v1114_v3 }
 0x4c7   : > { %2736 = vmatpush3.bf16.msra.mxu0 %v1234_v4  ;;  %2737 = vmatprep.mubr.msk.bf16.mxu0 %vm3127_vm1, %v3126_v8  ;;  %v2983_v4 = vld [vmem:[%s3213_s12] sm:$0xff]  }
 0x4c8   : > { %2749 = vmatprep.subr.bf16.mxu0 %v3126_v8 }
 0x4c9   : > { %v3017_v5 = vpop.eup %3016 }
 0x4ca   : > { %v1226_v6 = vmul.f32 %v3017_v5, %v3013_v57  ;;  %v2578_v57 = vld [vmem:[%s3198_s24] ss:$0 sm:$0xff] }
 0x4cc   : > { %v1227_v7 = vpack.c.bf16 %v1226_v6, %v1226_v6  ;;  %v2984_v6 = vld [vmem:[%s3642_s28 + $0x8] sm:$0xff]  }
 0x4ce   : > { %2738 = vmatmul.mubr.msk.bf16.vlgmr.msra.gmra.mxu0 %vm1102_vm4, %v1227_v7  ;;  %v2985_v7 = vld [vmem:[%s3642_s28] sm:$0xff]  }
 0x4cf   : > { %2753 = vmatprep.mubr.msk.bf16.mxu0 %vm3127_vm1, %v3126_v8  ;;  %2750 = vmatpush3.bf16.msra.mxu0 %v2970_v22 }
 0x4d0   : > { %2751 = vmatprep.subr.bf16.mxu0 %v3126_v8 }
 0x4d3   : > { %2752 = vmatpush3.bf16.msra.mxu0 %v2971_v23 }
 0x4d4   : > { %2777 = vmatprep.subr.bf16.mxu0 %v3126_v8 }
 0x586   : > { %v1158_v11 = vpop.f32.mrf.mxu0 }
 0x588   : > { %v2727_v12 = vpop.f32.mrf.mxu0 }
 0x58a   : > { %v1161_v13 = vpop.f32.mrf.mxu0 }
 0x58c   : > { %v2728_v14 = vpop.f32.mrf.mxu0 }
 0x58e   : > { %v1270_v15 = vpop.f32.mrf.mxu0 }
 0x58f   : > { %1277 = vrot.lane.b32.xlu1 %v1270_v15, %s3610_s23  ;;  %s3643_s23 = sshll.u32 %s3345_s11, 3  ;;  %s3644_s11 = sld [smem:[#allocation10_spill]] }
 0x590   : > { %v2739_v16 = vpop.f32.mrf.mxu0  ;;  %s942_s1 = scalar_lea.vmem %s3641_s9, %s3643_s23  ;;  %s3645_s23 = sld [smem:[#allocation9_spill]] }
 0x591   : > { %v945_v3 = vld [vmem:[%s942_s1] sm:$0xff]  ;;  %s3646_s1 = sld [smem:[#allocation12_spill]] }
 0x592   : > { %v1273_v17 = vpop.f32.mrf.mxu0  ;;  %v1610_v5 = vpack.c.bf16 %v945_v3, %v945_v3 }
 0x594   : > { %v2740_v18 = vpop.f32.mrf.mxu0 }
 0x595   : > { %v2591_v13 = vld [vmem:[%s3644_s11] ss:$0 sm:$0xff]  ;;  %s3648_s11 = sld [smem:[#allocation13_spill]] }
 0x596   : > { %v2587_v14 = vld [vmem:[%s3645_s23] ss:$0 sm:$0xff]  ;;  %s3650_s23 = smov 16  }
 0x601   : > { %v1278_v19 = vpop.permute.xlu1 %1277 }
 0x602   : > { %v1280_v20 = vsel %vm1053_vm2, %v1158_v11, %v1278_v19 }
 0x603   : > { %v1286_v21 = vpack.c.bf16 %v1280_v20, %v1280_v20 }
 0x605   : > { %2746 = vmatmul.mubr.msk.bf16.vlgmr.msra.gmra.mxu1 %vm948_vm0, %v1286_v21 }
 0x606   : > { %2773 = vmatprep.mubr.msk.bf16.mxu1 %vm3127_vm1, %v3126_v8  ;;  %2758 = vmatpush3.bf16.msra.mxu1 %v2972_v32 }
 0x607   : > { %2759 = vmatprep.subr.bf16.mxu1 %v3126_v8 }
 0x60a   : > { %2760 = vmatpush3.bf16.msra.mxu1 %v2973_v33 }
 0x60b   : > { %2761 = vmatprep.subr.bf16.mxu1 %v3126_v8 }
 0x6c5   : > { %v1342_v25 = vpop.f32.mrf.mxu1 }
 0x6c6   : > { %v1343_v26 = vadd.f32 %v2570_v24, %v1342_v25  ;;  %v2595_v24 = vld [vmem:[%s3646_s1] ss:$0 sm:$0xff]  ;;  %s3651_s1 = sld [smem:[#allocation17_spill]] }
 0x6c7   : > { %v2747_v27 = vpop.f32.mrf.mxu1 }
 0x6c8   : > { %v1348_v28 = vadd.f32 %v1343_v26, %v3351_v0  ;;  %v2974_v0 = vld [vmem:[%s3193_s19 + $0x28] sm:$0xff]  }
 0x6c9   : > { %v1345_v29 = vpop.f32.mrf.mxu1  ;;  %2762 = vmatpush3.bf16.msra.mxu1 %v2974_v0 }
 0x6ca   : > { %v1354_v30 = vpack.c.bf16 %v1348_v28, %v1348_v28  ;;  %2763 = vmatprep.subr.bf16.mxu1 %v3126_v8 }
 0x6cb   : > { %v2748_v31 = vpop.f32.mrf.mxu1 }
 0x6cc   : > { %2754 = vmatmul.mubr.msk.bf16.vlgmr.msra.gmra.mxu0 %vm948_vm0, %v1354_v30 }
 0x6cd   : > { %2781 = vmatprep.mubr.msk.bf16.mxu0 %vm3127_vm1, %v3126_v8  ;;  %2764 = vmatpush3.bf16.msra.mxu1 %v2975_v34 }
 0x6ce   : > { %2765 = vmatprep.subr.bf16.mxu1 %v3126_v8  ;;  %2778 = vmatpush3.bf16.msra.mxu0 %v2980_v55 }
 0x6cf   : > { %2779 = vmatprep.subr.bf16.mxu0 %v3126_v8 }
 0x6d1   : > { %2766 = vmatpush3.bf16.msra.mxu1 %v2976_v35 }
 0x6d2   : > { %2767 = vmatprep.subr.bf16.mxu1 %v3126_v8  ;;  %2780 = vmatpush3.bf16.msra.mxu0 %v2981_v56 }
 0x6d3   : > { %2785 = vmatprep.subr.bf16.mxu0 %v3126_v8 }
 0x6d5   : > { %2768 = vmatpush3.bf16.msra.mxu1 %v2977_v36 }
 0x6d6   : > { %2769 = vmatprep.subr.bf16.mxu1 %v3126_v8 }
 0x6d9   : > { %2770 = vmatpush3.bf16.msra.mxu1 %v2978_v37 }
 0x6da   : > { %2771 = vmatprep.subr.bf16.mxu1 %v3126_v8 }
 0x6dd   : > { %2772 = vmatpush3.bf16.msra.mxu1 %v2979_v38 }
 0x6de   : > { %2807 = vmatprep.subr.bf16.mxu1 %v3126_v8 }
 0x78c   : > { %v1410_v40 = vpop.f32.mrf.mxu0 }
 0x78d   : > { %v1411_v41 = vadd.f32 %v2574_v39, %v1410_v40 }
 0x78e   : > { %v2755_v42 = vpop.f32.mrf.mxu0 }
 0x78f   : > { %v1417_v43 = vmul.f32 0.044715, %v1411_v41  ;;  %v1416_v51 = vmul.f32 0.5, %v1411_v41 }
 0x790   : > { %v1413_v44 = vpop.f32.mrf.mxu0 }
 0x791   : > { %v1418_v45 = vmul.f32 %v1417_v43, %v1411_v41 }
 0x792   : > { %v2756_v46 = vpop.f32.mrf.mxu0 }
 0x793   : > { %v1419_v47 = vmul.f32 %v1418_v45, %v1411_v41 }
 0x795   : > { %v1420_v48 = vadd.f32 %v1419_v47, %v1411_v41 }
 0x797   : > { %v1421_v49 = vmul.f32 0.7978846, %v1420_v48 }
 0x799   : > { %3018 = vtanh.f32 %v1421_v49 }
 0x7a6   : > { %v3019_v50 = vpop.eup %3018 }
 0x7a7   : > { %v1423_v52 = vadd.f32 1.0, %v3019_v50 }
 0x7a9   : > { %v1424_v53 = vmul.f32 %v1423_v52, %v1416_v51 }
 0x7ab   : > { %v1442_v54 = vpack.c.bf16 %v1424_v53, %v1424_v53 }
 0x7ad   : > { %2774 = vmatmul.mubr.bf16.vlgmr.msra.gmra.mxu1 %v1442_v54 }
 0x7ae   : > { %2809 = vmatprep.mubr.msk.bf16.mxu1 %vm3127_vm1, %v3126_v8 }
 0x86d   : > { %v1531_v58 = vpop.f32.mrf.mxu1 }
 0x86e   : > { %v1532_v59 = vadd.f32 %v2578_v57, %v1531_v58 }
 0x86f   : > { %v2775_v60 = vpop.f32.mrf.mxu1 }
 0x870   : > { %v3440_v61 = vadd.f32 %v1532_v59, %v1348_v28 }
 0x871   : > { %v1534_v62 = vpop.f32.mrf.mxu1 }
 0x872   : > { %v1543_v1 = vpack.c.bf16 %v3440_v61, %v3440_v61 }
 0x873   : > { %v2776_v2 = vpop.f32.mrf.mxu1 }
 0x874   : > { %2782 = vmatmul.mubr.msk.bf16.vlgmr.msra.gmra.mxu0 %vm948_vm0, %v1543_v1 }
 0x875   : > { %2786 = vmatpush3.bf16.msra.mxu0 %v2982_v63  ;;  %2789 = vmatprep.mubr.msk.bf16.mxu0 %vm3127_vm1, %v3126_v8 }
 0x876   : > { %2787 = vmatprep.subr.bf16.mxu0 %v3126_v8 }
 0x879   : > { %2788 = vmatpush3.bf16.msra.mxu0 %v2983_v4  ;;  %v2986_v4 = vld [vmem:[%s3648_s11 + $0x8] sm:$0xff]  }
 0x87a   : > { %2793 = vmatprep.subr.bf16.mxu0 %v3126_v8 }
 0x87c   : > { %2790 = vmatmul.mubr.msk.bf16.vlgmr.msra.gmra.mxu0 %vm948_vm0, %v1610_v5 }
 0x87d   : > { %2797 = vmatprep.mubr.msk.bf16.mxu0 %vm3127_vm1, %v3126_v8  ;;  %2794 = vmatpush3.bf16.msra.mxu0 %v2984_v6 }
 0x87e   : > { %2795 = vmatprep.subr.bf16.mxu0 %v3126_v8 }
 0x881   : > { %2796 = vmatpush3.bf16.msra.mxu0 %v2985_v7 }
 0x882   : > { %2801 = vmatprep.subr.bf16.mxu0 %v3126_v8 }
 0x884   : > { %2798 = vmatmul.mubr.msk.bf16.vlgmr.msra.gmra.mxu0 %vm948_vm0, %v1610_v5 }
 0x885   : > { %2803 = vmatprep.mubr.msk.bf16.mxu0 %vm3127_vm1, %v3126_v8 }
 0x934   : > { %v1599_v9 = vpop.f32.mrf.mxu0 }
 0x935   : > { %v1600_v18 = vadd.f32 %v2587_v14, %v1599_v9 }
 0x936   : > { %v2783_v10 = vpop.f32.mrf.mxu0 }
 0x937   : > { %v1735_v23 = vpack.c.bf16 %v1600_v18, %v1600_v18  ;;  %v2987_v10 = vld [vmem:[%s3648_s11] sm:$0xff]  }
 0x938   : > { %v1602_v11 = vpop.f32.mrf.mxu0 }
 0x93a   : > { %v2784_v12 = vpop.f32.mrf.mxu0 }
 0x93c   : > { %v1666_v15 = vpop.f32.mrf.mxu0 }
 0x93d   : > { %v1667_v16 = vadd.f32 %v2591_v13, %v1666_v15 }
 0x93e   : > { %v2791_v17 = vpop.f32.mrf.mxu0 }
 0x93f   : > { %v1736_v19 = vpack.c.bf16 %v1667_v16, %v1667_v16 }
 0x940   : > { %v1669_v20 = vpop.f32.mrf.mxu0 }
 0x941   : > { %v1742_v21 = vsel %vm1053_vm2, %v1736_v19, 0  ;;  %1847 = vrot.lane.b32.xlu1 %v1736_v19, %s3647_s3 }
 0x942   : > { %v2792_v22 = vpop.f32.mrf.mxu0  ;;  %2802 = vmatpush3.bf16.xpose.msra.mxu0 %v1742_v21 }
 0x943   : > { %2813 = vmatprep.subr.bf16.mxu0 %v3126_v8 }
 0x944   : > { %v1729_v25 = vpop.f32.mrf.mxu0 }
 0x945   : > { %1844 = vrot.lane.b32.xlu1 %v1735_v23, %s3647_s3  ;;  %v1730_v26 = vadd.f32 %v2595_v24, %v1729_v25 }
 0x946   : > { %v2799_v27 = vpop.f32.mrf.mxu0 }
 0x947   : > { %v1737_v28 = vpack.c.bf16 %v1730_v26, %v1730_v26 }
 0x948   : > { %v1732_v29 = vpop.f32.mrf.mxu0 }
 0x949   : > { %2804 = vmatmul.mubr.msk.bf16.vlgmr.msra.gmra.mxu0 %vm1053_vm2, %v1735_v23  ;;  %v1801_v30 = vsel %vm1120_vm5, %v1737_v28, 0 }
 0x94a   : > { %2815 = vmatprep.mubr.msk.bf16.mxu0 %vm3127_vm1, %v3126_v8  ;;  %v2800_v31 = vpop.f32.mrf.mxu0  ;;  %2808 = vmatpush3.bf16.msra.mxu1 %v1801_v30 }
 0x94b   : > { %2819 = vmatprep.subr.bf16.mxu1 %v3126_v8  ;;  %v2988_v31 = vld [vmem:[%s3651_s1 + $0x8] sm:$0xff]  }
 0x9b3   : > { %v1848_v32 = vpop.permute.xlu1 %1847 }
 0x9b4   : > { %v1853_v33 = vsel %vm1053_vm2, %v1848_v32, 0 }
 0x9b5   : > { %2814 = vmatpush3.bf16.xpose.msra.mxu0 %v1853_v33 }
 0x9b6   : > { %2825 = vmatprep.subr.bf16.mxu0 %v3126_v8 }
 0x9b7   : > { %v1845_v0 = vpop.permute.xlu1 %1844 }
 0x9bc   : > { %2816 = vmatmul.mubr.msk.bf16.vlgmr.msra.gmra.mxu0 %vm1053_vm2, %v1845_v0 }
 0x9bd   : > { %2829 = vmatprep.mubr.msk.bf16.mxu0 %vm3127_vm1, %v3126_v8  ;;  %2826 = vmatpush3.bf16.msra.mxu0 %v2986_v4 }
 0x9be   : > { %2827 = vmatprep.subr.bf16.mxu0 %v3126_v8 }
 0x9c1   : > { %2828 = vmatpush3.bf16.msra.mxu0 %v2987_v10 }
 0x9c2   : > { %2841 = vmatprep.subr.bf16.mxu0 %v3126_v8 }
 0xa09   : > { %v1778_v34 = vpop.f32.mrf.mxu0 }
 0xa0a   : > { %v1784_v35 = vmul.f32 0.25, %v1778_v34 }
 0xa0b   : > { %v2805_v36 = vpop.f32.mrf.mxu0 }
 0xa0c   : > { %v1785_v37 = vsel %vm1102_vm4, %v1784_v35, -inf }
 0xa0d   : > { %1786 = vmax.xlane.f32.xlu1 %v1785_v37  ;;  %v1781_v38 = vpop.f32.mrf.mxu0 }
 0xa0f   : > { %v2806_v39 = vpop.f32.mrf.mxu0 }
 0xa7c   : > { %v1889_v40 = vpop.f32.mrf.mxu0 }
 0xa7d   : > { %v1895_v41 = vmul.f32 0.25, %v1889_v40 }
 0xa7e   : > { %v2817_v42 = vpop.f32.mrf.mxu0 }
 0xa7f   : > { %v1896_v43 = vsel %vm1102_vm4, %v1895_v41, -inf  ;;  %v2991_v42 = vld [vmem:[%s3654_s5 + $0x30] sm:$0xff]  }
 0xa80   : > { %1897 = vmax.xlane.f32.xlu0 %v1896_v43  ;;  %v1892_v44 = vpop.f32.mrf.mxu0  ;;  %v2992_v43 = vld [vmem:[%s3654_s5 + $0x28] sm:$0xff]  }
 0xa81   : > { %v2993_v44 = vld [vmem:[%s3654_s5 + $0x20] sm:$0xff]  }
 0xa82   : > { %v2818_v45 = vpop.f32.mrf.mxu0 }
 0xa83   : > { %v2994_v45 = vld [vmem:[%s3654_s5 + $0x18] sm:$0xff]  }
 0xa96   : > { %v1787_v46 = vpop.xlane.xlu1 %1786 }
 0xa97   : > { %v1788_v47 = vsub.f32 %v1784_v35, %v1787_v46  ;;  %v2995_v46 = vld [vmem:[%s3654_s5 + $0x10] sm:$0xff]  }
 0xa99   : > { %v1789_v48 = vmul.f32 1.442695, %v1788_v47  ;;  %v2996_v47 = vld [vmem:[%s3654_s5 + $0x8] sm:$0xff]  }
 0xa9b   : > { %3020 = vpow2.f32 %v1789_v48  ;;  %v2997_v48 = vld [vmem:[%s3654_s5] sm:$0xff]  }
 0xaa8   : > { %v3021_v49 = vpop.eup %3020 }
 0xaa9   : > { %v1791_v50 = vsel %vm1102_vm4, %v3021_v49, 0.0 }
 0xaaa   : > { %1792 = vadd.xlane.f32.xlu0 %v1791_v50 }
 0xac0   : > { %1909 = vrot.lane.b32.xlu0 %v1737_v28, %s3647_s3  ;;  %s3649_s3 = sld [smem:[#allocation14_spill]] }
 0xac6   : > { %v2603_v18 = vld [vmem:[%s3649_s3] ss:$0 sm:$0xff]  ;;  %s3653_s3 = sld [smem:[#allocation16_spill]] }
 0xacc   : > { %v2608_v37 = vld [vmem:[%s3653_s3] ss:$0 sm:$0xff]  ;;  %s3656_s3 = sld [smem:[#allocation21_spill]] }
 0xad2   : > { %v2999_v4 = vld [vmem:[%s3656_s3] sm:$0xff]  }
 0xb09   : > { %v1898_v51 = vpop.xlane.xlu0 %1897 }
 0xb0a   : > { %v1899_v52 = vsub.f32 %v1895_v41, %v1898_v51  ;;  %v2990_v41 = vld [vmem:[%s3654_s5 + $0x38] sm:$0xff]  }
 0xb0c   : > { %v1900_v53 = vmul.f32 1.442695, %v1899_v52 }
 0xb0e   : > { %3022 = vpow2.f32 %v1900_v53 }
 0xb1b   : > { %v3023_v54 = vpop.eup %3022 }
 0xb1c   : > { %v1902_v55 = vsel %vm1102_vm4, %v3023_v54, 0.0 }
 0xb1d   : > { %1903 = vadd.xlane.f32.xlu1 %v1902_v55 }
 0xb33   : > { %v1793_v56 = vpop.xlane.xlu0 %1792 }
 0xb34   : > { %3024 = vrcp.f32 %v1793_v56 }
 0xb37   : > { %v1910_v59 = vpop.permute.xlu0 %1909 }
 0xb38   : > { %v1915_v62 = vsel %vm1120_vm5, %v1910_v59, 0 }
 0xb41   : > { %v3025_v57 = vpop.eup %3024 }
 0xb42   : > { %v1795_v58 = vmul.f32 %v3025_v57, %v3021_v49 }
 0xb44   : > { %v1796_v60 = vpack.c.bf16 %v1795_v58, %v1795_v58 }
 0xb46   : > { %2810 = vmatmul.mubr.msk.bf16.vlgmr.msra.gmra.mxu1 %vm1102_vm4, %v1796_v60 }
 0xb47   : > { %2820 = vmatpush3.bf16.msra.mxu1 %v1915_v62  ;;  %2821 = vmatprep.mubr.msk.bf16.mxu1 %vm3127_vm1, %v3126_v8 }
 0xb48   : > { %2833 = vmatprep.subr.bf16.mxu1 %v3126_v8 }
 0xba6   : > { %v1904_v63 = vpop.xlane.xlu1 %1903 }
 0xba7   : > { %3026 = vrcp.f32 %v1904_v63 }
 0xbb4   : > { %v3027_v1 = vpop.eup %3026 }
 0xbb5   : > { %v1906_v2 = vmul.f32 %v3027_v1, %v3023_v54 }
 0xbb7   : > { %v1907_v3 = vpack.c.bf16 %v1906_v2, %v1906_v2 }
 0xbb9   : > { %2822 = vmatmul.mubr.msk.bf16.vlgmr.msra.gmra.mxu1 %vm1102_vm4, %v1907_v3  ;;  %v2998_v3 = vld [vmem:[%s3656_s3 + $0x8] sm:$0xff]   ;;  %s2636_s3 = sshll.u32 %s3316_s0, 7  ;;  %s3134_s0 = smov [#allocation2]  }
 0xbba   : > { %2837 = vmatprep.mubr.msk.bf16.mxu1 %vm3127_vm1, %v3126_v8  ;;  %2834 = vmatpush3.bf16.msra.mxu1 %v2988_v31  ;;  %s3565_s9 = scalar_lea.hbm %s3293_s6, %s2636_s3 }
 0xbbb   : > { %2835 = vmatprep.subr.bf16.mxu1 %v3126_v8 }
 0xc06   : > { %v1837_v5 = vpop.f32.mrf.mxu1 }
 0xc08   : > { %v2811_v6 = vpop.f32.mrf.mxu1 }
 0xc0a   : > { %v1840_v7 = vpop.f32.mrf.mxu1 }
 0xc0c   : > { %v2812_v9 = vpop.f32.mrf.mxu1 }
 0xc79   : > { %v1951_v11 = vpop.f32.mrf.mxu1 }
 0xc7a   : > { %1958 = vrot.lane.b32.xlu1 %v1951_v11, %s3650_s23  ;;  %s3652_s23 = sld [smem:[#allocation15_spill]] }
 0xc7b   : > { %v2823_v12 = vpop.f32.mrf.mxu1 }
 0xc7d   : > { %v1954_v13 = vpop.f32.mrf.mxu1 }
 0xc7f   : > { %v2824_v14 = vpop.f32.mrf.mxu1 }
 0xc80   : > { %v2607_v35 = vld [vmem:[%s3652_s23] ss:$0 sm:$0xff]  ;;  %s3655_s23 = sld [smem:[#allocation18_spill]]  ;;  %v3000_v14 = vld [vmem:[%s3283_s27 + $0x38] sm:$0xff]  }
 0xc86   : > { %v2609_v49 = vld [vmem:[%s3655_s23] ss:$0 sm:$0xff] }
 0xcec   : > { %v1959_v15 = vpop.permute.xlu1 %1958 }
 0xced   : > { %v1961_v16 = vsel %vm1053_vm2, %v1837_v5, %v1959_v15  ;;  %v3001_v15 = vld [vmem:[%s3283_s27 + $0x30] sm:$0xff]  }
 0xcee   : > { %v1967_v17 = vpack.c.bf16 %v1961_v16, %v1961_v16  ;;  %v3002_v16 = vld [vmem:[%s3283_s27 + $0x28] sm:$0xff]  }
 0xcf0   : > { %2830 = vmatmul.mubr.msk.bf16.vlgmr.msra.gmra.mxu0 %vm948_vm0, %v1967_v17  ;;  %v3003_v17 = vld [vmem:[%s3283_s27 + $0x20] sm:$0xff]  }
 0xcf1   : > { %2857 = vmatprep.mubr.msk.bf16.mxu0 %vm3127_vm1, %v3126_v8  ;;  %2842 = vmatpush3.bf16.msra.mxu0 %v2990_v41 }
 0xcf2   : > { %2843 = vmatprep.subr.bf16.mxu0 %v3126_v8 }
 0xcf5   : > { %2844 = vmatpush3.bf16.msra.mxu0 %v2991_v42 }
 0xcf6   : > { %2845 = vmatprep.subr.bf16.mxu0 %v3126_v8 }
 0xcf9   : > { %2846 = vmatpush3.bf16.msra.mxu0 %v2992_v43 }
 0xcfa   : > { %2847 = vmatprep.subr.bf16.mxu0 %v3126_v8 }
 0xcfd   : > { %2848 = vmatpush3.bf16.msra.mxu0 %v2993_v44 }
 0xcfe   : > { %2849 = vmatprep.subr.bf16.mxu0 %v3126_v8 }
 0xd01   : > { %2850 = vmatpush3.bf16.msra.mxu0 %v2994_v45 }
 0xd02   : > { %2851 = vmatprep.subr.bf16.mxu0 %v3126_v8 }
 0xd05   : > { %2852 = vmatpush3.bf16.msra.mxu0 %v2995_v46 }
 0xd06   : > { %2853 = vmatprep.subr.bf16.mxu0 %v3126_v8 }
 0xd09   : > { %2854 = vmatpush3.bf16.msra.mxu0 %v2996_v47 }
 0xd0a   : > { %2855 = vmatprep.subr.bf16.mxu0 %v3126_v8 }
 0xd0d   : > { %2856 = vmatpush3.bf16.msra.mxu0 %v2997_v48 }
 0xdb0   : > { %v2023_v19 = vpop.f32.mrf.mxu0 }
 0xdb1   : > { %v2024_v20 = vadd.f32 %v2603_v18, %v2023_v19  ;;  %v3004_v18 = vld [vmem:[%s3283_s27 + $0x18] sm:$0xff]   ;;  %v3005_v19 = vld [vmem:[%s3283_s27 + $0x10] sm:$0xff]  }
 0xdb2   : > { %v2831_v21 = vpop.f32.mrf.mxu0 }
 0xdb3   : > { %v3505_v22 = vadd.f32 %v2024_v20, %v3440_v61  ;;  %v2989_v61 = vld [vmem:[%s3651_s1] sm:$0xff]   ;;  %s3657_s1 = sld [smem:[#allocation20_spill]]  ;;  %v3006_v20 = vld [vmem:[%s3283_s27 + $0x8] sm:$0xff]  }
 0xdb4   : > { %v2026_v23 = vpop.f32.mrf.mxu0  ;;  %2836 = vmatpush3.bf16.msra.mxu1 %v2989_v61  ;;  %v3007_v21 = vld [vmem:[%s3283_s27] sm:$0xff]  }
 0xdb5   : > { %v2032_v24 = vsel %vm948_vm0, %v3505_v22, 0.0  ;;  %2861 = vmatprep.subr.bf16.mxu1 %v3126_v8 }
 0xdb6   : > { %2033 = vadd.xlane.f32.xlu1 %v2032_v24  ;;  %v2832_v25 = vpop.f32.mrf.mxu0 }
 0xdb9   : > { %v2613_v5 = vld [vmem:[%s3657_s1] ss:$0 sm:$0xff]  ;;  %s932_s1 = sand.u32 1, %s3086_s16  }
 0xdba   : > { %s2557_s23 = sshll.u32 %s932_s1, 3 }
 0xdbb   : > { %s934_s5 = scalar_lea.vmem [#allocation2], %s2557_s23  ;;  %s3038_s23 = sshll.u32 %s3134_s0, 4  ;;  %s3039_s23 = int_to_ptr.vmem [resolvable:$false] %s3038_s23 }
 0xdbc   : > { %s2452_s8 = sshll.u32 %s934_s5, 4  ;;  %s3040_s3 = scalar_lea.vmem %s3039_s23, 256  ;;  %s3567_s8 = int_to_ptr.vmem [resolvable:$true] %s2452_s8 }
 0xdbd   : > { %s3034_s11 = scalar_lea.vmem %s3567_s8, 128  ;;  %p3041_p0 = scmp.lt.s32.totalorder %s3567_s8, %s3039_s23 }
 0xdbe   : > { %p3035_p11 = scmp.ne.s32.totalorder %s3567_s8, %s3034_s11  ;;  %p3042_p1 = scmp.lt.s32.totalorder %s3040_s3, %s3034_s11 }
 0xdc0   : > { %p3036_p12 = pnand %p3035_p11, %p3333_p5  ;;  %p3043_p2 = por %p3042_p1, %p3041_p0 }
 0xdc2   : > { %p3037_p13 = pneg %p3036_p12 }
 0xdc4   : > { %p3044_p3 = pnand %p3043_p2, %p3037_p13 }
 0xe3f   : > { %v2034_v26 = vpop.xlane.xlu1 %2033 }
 0xe40   : > { %v2035_v27 = vmul.f32 0.03125, %v2034_v26 }
 0xe42   : > { %v2036_v28 = vsub.f32 %v3505_v22, %v2035_v27 }
 0xe44   : > { %v2037_v29 = vmul.f32 %v2036_v28, %v2036_v28 }
 0xe46   : > { %v2038_v30 = vsel %vm948_vm0, %v2037_v29, 0.0 }
 0xe47   : > { %2039 = vadd.xlane.f32.xlu0 %v2038_v30 }
 0xed0   : > { %v2040_v32 = vpop.xlane.xlu0 %2039 }
 0xed1   : > { %v2041_v33 = vmul.f32 0.03125, %v2040_v32 }
 0xed3   : > { %v2042_v0 = vadd.f32 1e-05, %v2041_v33 }
 0xed5   : > { %3028 = vrsqrt.f32 %v2042_v0 }
 0xee2   : > { %v3029_v34 = vpop.eup %3028 }
 0xee3   : > { %v2044_v36 = vmul.f32 %v3029_v34, %v2036_v28 }
 0xee5   : > { %v2051_v38 = vmul.f32 %v2607_v35, %v2044_v36  ;;  %v2626_v35 = vld [vmem:[%s3658_s4] ss:$0 sm:$0xff]  ;;  %s2439_s4 = scalar_lea.sflag [#allocation3], %s932_s1 }
 0xee7   : > { %v2058_v39 = vadd.f32 %v2608_v37, %v2051_v38 }
 0xee9   : > { %v2064_v40 = vpack.c.bf16 %v2058_v39, %v2058_v39 }
 0xeeb   : > { %2838 = vmatmul.mubr.msk.bf16.vlgmr.msra.gmra.mxu1 %vm948_vm0, %v2064_v40 }
 0xeec   : > { %2865 = vmatprep.mubr.msk.bf16.mxu1 %vm3127_vm1, %v3126_v8  ;;  %2862 = vmatpush3.bf16.msra.mxu1 %v2998_v3 }
 0xeed   : > { %2863 = vmatprep.subr.bf16.mxu1 %v3126_v8 }
 0xef0   : > { %2864 = vmatpush3.bf16.msra.mxu1 %v2999_v4 }
 0xef1   : > { %2869 = vmatprep.subr.bf16.mxu1 %v3126_v8 }
 0xfab   : > { %v2120_v50 = vpop.f32.mrf.mxu1 }
 0xfac   : > { %v2121_v51 = vadd.f32 %v2609_v49, %v2120_v50 }
 0xfad   : > { %v2839_v52 = vpop.f32.mrf.mxu1 }
 0xfae   : > { %v2127_v53 = vmul.f32 0.044715, %v2121_v51  ;;  %v2126_v62 = vmul.f32 0.5, %v2121_v51 }
 0xfaf   : > { %v2123_v54 = vpop.f32.mrf.mxu1 }
 0xfb0   : > { %v2128_v55 = vmul.f32 %v2127_v53, %v2121_v51 }
 0xfb1   : > { %v2840_v56 = vpop.f32.mrf.mxu1 }
 0xfb2   : > { %v2129_v57 = vmul.f32 %v2128_v55, %v2121_v51 }
 0xfb4   : > { %v2130_v58 = vadd.f32 %v2129_v57, %v2121_v51 }
 0xfb6   : > { %v2131_v59 = vmul.f32 0.7978846, %v2130_v58 }
 0xfb8   : > { %3030 = vtanh.f32 %v2131_v59 }
 0xfc5   : > { %v3031_v60 = vpop.eup %3030 }
 0xfc6   : > { %v2133_v63 = vadd.f32 1.0, %v3031_v60 }
 0xfc8   : > { %v2134_v1 = vmul.f32 %v2133_v63, %v2126_v62 }
 0xfca   : > { %v2152_v2 = vpack.c.bf16 %v2134_v1, %v2134_v1 }
 0xfcc   : > { %2858 = vmatmul.mubr.bf16.vlgmr.msra.gmra.mxu0 %v2152_v2 }
0x108c   : > { %v2241_v6 = vpop.f32.mrf.mxu0 }
0x108d   : > { %v2242_v7 = vadd.f32 %v2613_v5, %v2241_v6 }
0x108e   : > { %v2859_v9 = vpop.f32.mrf.mxu0 }
0x108f   : > { %v2247_v10 = vadd.f32 %v2242_v7, %v3505_v22  ;;  %v2622_v22 = vld [vmem:[%s3278_s20] ss:$0 sm:$0xff] }
0x1090   : > { %v2244_v11 = vpop.f32.mrf.mxu0 }
0x1091   : > { %v2253_v12 = vpack.c.bf16 %v2247_v10, %v2247_v10 }
0x1092   : > { %v2860_v13 = vpop.f32.mrf.mxu0 }
0x1093   : > { %2866 = vmatmul.mubr.msk.bf16.vlgmr.msra.gmra.mxu1 %vm948_vm0, %v2253_v12 }
0x1094   : > { %2885 = vmatprep.mubr.msk.bf16.mxu1 %vm3127_vm1, %v3126_v8  ;;  %2870 = vmatpush3.bf16.msra.mxu1 %v3000_v14 }
0x1095   : > { %2871 = vmatprep.subr.bf16.mxu1 %v3126_v8 }
0x1098   : > { %2872 = vmatpush3.bf16.msra.mxu1 %v3001_v15 }
0x1099   : > { %2873 = vmatprep.subr.bf16.mxu1 %v3126_v8 }
0x109c   : > { %2874 = vmatpush3.bf16.msra.mxu1 %v3002_v16 }
0x109d   : > { %2875 = vmatprep.subr.bf16.mxu1 %v3126_v8 }
0x10a0   : > { %2876 = vmatpush3.bf16.msra.mxu1 %v3003_v17 }
0x10a1   : > { %2877 = vmatprep.subr.bf16.mxu1 %v3126_v8 }
0x10a4   : > { %2878 = vmatpush3.bf16.msra.mxu1 %v3004_v18 }
0x10a5   : > { %2879 = vmatprep.subr.bf16.mxu1 %v3126_v8 }
0x10a8   : > { %2880 = vmatpush3.bf16.msra.mxu1 %v3005_v19 }
0x10a9   : > { %2881 = vmatprep.subr.bf16.mxu1 %v3126_v8 }
0x10ac   : > { %2882 = vmatpush3.bf16.msra.mxu1 %v3006_v20 }
0x10ad   : > { %2883 = vmatprep.subr.bf16.mxu1 %v3126_v8 }
0x10b0   : > { %2884 = vmatpush3.bf16.msra.mxu1 %v3007_v21 }
0x1153   : > { %v2309_v23 = vpop.f32.mrf.mxu1 }
0x1154   : > { %v2310_v24 = vadd.f32 %v2622_v22, %v2309_v23 }
0x1155   : > { %v2867_v25 = vpop.f32.mrf.mxu1 }
0x1156   : > { %v2316_v26 = vmul.f32 0.044715, %v2310_v24  ;;  %v2315_v33 = vmul.f32 0.5, %v2310_v24 }
0x1157   : > { %v2312_v27 = vpop.f32.mrf.mxu1 }
0x1158   : > { %v2317_v28 = vmul.f32 %v2316_v26, %v2310_v24 }
0x1159   : > { %v2868_v29 = vpop.f32.mrf.mxu1 }
0x115a   : > { %v2318_v30 = vmul.f32 %v2317_v28, %v2310_v24 }
0x115c   : > { %v2319_v31 = vadd.f32 %v2318_v30, %v2310_v24 }
0x115e   : > { %v2320_v61 = vmul.f32 0.7978846, %v2319_v31 }
0x1160   : > { %3032 = vtanh.f32 %v2320_v61 }
0x116d   : > { %v3033_v32 = vpop.eup %3032 }
0x116e   : > { %v2322_v8 = vadd.f32 1.0, %v3033_v32 }
0x1170   : > { %v2323_v0 = vmul.f32 %v2322_v8, %v2315_v33 }
0x1172   : > { %v2341_v34 = vpack.c.bf16 %v2323_v0, %v2323_v0 }
0x1174   : > { %2886 = vmatmul.mubr.bf16.vlgmr.msra.gmra.mxu1 %v2341_v34 }
0x1234   : > { %v2430_v36 = vpop.f32.mrf.mxu1 }
0x1235   : > { %v2431_v37 = vadd.f32 %v2626_v35, %v2430_v36 }
0x1236   : > { %v2887_v38 = vpop.f32.mrf.mxu1 }
0x1237   : > { %v2436_v39 = vadd.f32 %v2431_v37, %v2247_v10 }
0x1238   : > { %v2433_v40 = vpop.f32.mrf.mxu1 }
0x1239   : > { %2437 = vst.msk [vmem:[%s934_s5] sm:$0xff] %vm948_vm0, %v2436_v39 }
0x123a   : > { %v2888_v41 = vpop.f32.mrf.mxu1 }
0x123b   : > { %3047 = shalt.err (!%p3044_p3)
}
0x123c   : > { %s3048_s5 = scalar_lea.hbm %s3565_s9, 128  ;;  %s3052_s1 = scalar_lea.hbm %s3293_s6, 256 }
0x123d   : > { %p3049_p4 = scmp.ne.s32.totalorder %s3565_s9, %s3048_s5  ;;  %p3053_p9 = scmp.lt.s32.totalorder %s3565_s9, %s3293_s6 }
0x123e   : > { %p3054_p10 = scmp.lt.s32.totalorder %s3052_s1, %s3048_s5 }
0x123f   : > { %p3050_p7 = pnand %p3049_p4, %p3333_p5 }
0x1240   : > { %p3055_p11 = por %p3054_p10, %p3053_p9 }
0x1241   : > { %p3051_p8 = pneg %p3050_p7 }
0x1243   : > { %p3056_p12 = pnand %p3055_p11, %p3051_p8 }
0x1245   : > { %3059 = shalt.err (!%p3056_p12)
}
0x1246   : > { %2889 = dma.vmem_to_hbm [thread:$0]  (%p3333_p5), %s3567_s8, 128, %s3565_s9, %s2439_s4  }
0x1247 PF: > { %p2895_p13 = scmp.ge.s32.totalorder %s3094_s22, 2  ;;  %s2464_s11 = sand.u32 1, %s3082_s15  }
0x1248   : > { %s2465_s0 = scalar_lea.sflag [#allocation3], %s2464_s11 }
0x1249   : > { %p2892_p0 = pnand %p2895_p13, %p3337_p6 }
0x124b   : > { %p2893_p1 = pneg %p2892_p0 }
0x124d   : > { %3077 = dma.done.wait (%p2893_p1), %s2465_s0, 128  }
0x124e   : > { %3079 = vsyncadd (%p2893_p1), %s2465_s0, 4294967168  ;;  %p71_p2 = scmp.ge.s32.totalorder %s3320_s26, 4   ;;  %s3659_s15 = smov %s3086_s16 }
0x124f   : > { %s3660_s16 = smov %s3090_s18  ;;  %s3661_s18 = smov %s3331_s2 }
0x1250   : > { %s3662_s22 = smov %s3320_s26  ;;  %73 = sbr.rel (!%p71_p2) target bundleno = 60 (0x3c), region = 208 }
0x1255   :  { %2470 = vsyncpa [#allocation3], 1 }
0x1256   :  { %2472 = vsyncpa [#allocation3 + $0x1], 1 }

</bundles_post_ra>
